<compile_context>
chip_gen: v7x
topology: tpu7x:2x2x1
jax: 0.10.0
libtpu: 0.0.40
codegen_flags: <defaults>
</compile_context>

<pallas_src>
import functools
import math

import jax
import jax.numpy as jnp
import numpy as np
from jax.experimental import pallas as pl
from jax.experimental.pallas import tpu as pltpu


# ----------------------------- kernel helpers -------------------------------
def _layernorm(x, scale, shift, eps=1e-5):
    # matches torch LayerNorm above: biased variance (unbiased=False)
    mean = jnp.mean(x, axis=-1, keepdims=True)
    var = jnp.mean((x - mean) ** 2, axis=-1, keepdims=True)
    return scale * ((x - mean) / jnp.sqrt(var + eps)) + shift


def _gelu_tanh(x):
    # 0.5 * x * (1 + tanh(sqrt(2/pi) * (x + 0.044715 x^3)))
    c = math.sqrt(2.0 / math.pi)
    return 0.5 * x * (1.0 + jnp.tanh(c * (x + 0.044715 * x * x * x)))


# --------------------------------- kernel -----------------------------------
def transformer_block_kernel(x_ref,
                             ln1_s_ref, ln1_b_ref,
                             wq_ref, wk_ref, wv_ref, wo_ref, bo_ref,
                             ln2_s_ref, ln2_b_ref,
                             w1_ref, b1_ref, w2_ref, b2_ref,
                             o_ref,
                             ctx_ref,                 # VMEM scratch (N, D) bf16
                             *, num_heads):
    x = x_ref[...].astype(jnp.float32)                # (bb, T, D)
    bb, T, D = x.shape
    hd = D // num_heads
    N = bb * T

    x2 = x.reshape(N, D)                              # flatten (batch, seq) rows

    # ---------------- attention sub-block ----------------
    h = _layernorm(x2, ln1_s_ref[...], ln1_b_ref[...])         # f32
    hb = h.astype(jnp.bfloat16)

    # 1/sqrt(head_dim) already folded into wq (wrapper).
    # Keep q/k/v resident in bf16 (halves VMEM, MXU-native operand dtype).
    q = jnp.dot(hb, wq_ref[...], preferred_element_type=jnp.float32
                ).astype(jnp.bfloat16).reshape(bb, T, D)
    k = jnp.dot(hb, wk_ref[...], preferred_element_type=jnp.float32
                ).astype(jnp.bfloat16).reshape(bb, T, D)
    v = jnp.dot(hb, wv_ref[...], preferred_element_type=jnp.float32
                ).astype(jnp.bfloat16).reshape(bb, T, D)

    row = jax.lax.broadcasted_iota(jnp.int32, (T, T), 0)
    col = jax.lax.broadcasted_iota(jnp.int32, (T, T), 1)
    # additive causal mask: finite large-negative, never produces inf/nan
    neg_mask = jnp.where(col > row, jnp.float32(-1e30), jnp.float32(0.0))

    # Per-head attention.  Each head's context goes into a bf16 VMEM scratch
    # so the output projection below runs as ONE full-K (K=D) MXU matmul.
    # TODO(synk): at realistic T, replace with flash-style KV tiling + causal
    # block skipping instead of materializing the (T, T) score matrix.
    for hh in range(num_heads):                       # static unroll, num_heads small
        sl = slice(hh * hd, (hh + 1) * hd)
        qh = q[:, :, sl]                              # (bb, T, hd) bf16
        kh = k[:, :, sl]
        vh = v[:, :, sl]

        s = jnp.einsum("bqd,bkd->bqk", qh, kh,
                       preferred_element_type=jnp.float32) + neg_mask
        s = s - jnp.max(s, axis=-1, keepdims=True)
        p = jnp.exp(s)                                # f32, values in [0, 1]
        denom = jnp.sum(p, axis=-1, keepdims=True)    # (bb, T, 1)

        # deferred softmax normalization: scale ctx (O(T*hd)) not p (O(T^2))
        ctx = jnp.einsum("bqk,bkd->bqd", p.astype(jnp.bfloat16), vh,
                         preferred_element_type=jnp.float32)
        ctx = ctx * pl.reciprocal(denom, approx=True)
        ctx_ref[:, sl] = ctx.reshape(N, hd).astype(jnp.bfloat16)

    # single full-D output projection (keeps the 256-wide MXU busy)
    attn = jnp.dot(ctx_ref[...], wo_ref[...],
                   preferred_element_type=jnp.float32) + bo_ref[...]

    x2 = x2 + attn                                    # residual 1 (dropout = identity)

    # ---------------- feed-forward sub-block ----------------
    h2 = _layernorm(x2, ln2_s_ref[...], ln2_b_ref[...])
    f = jnp.dot(h2.astype(jnp.bfloat16), w1_ref[...],
                preferred_element_type=jnp.float32) + b1_ref[...]
    f = _gelu_tanh(f)                                 # f32 (v5e has no bf16 VALU/EUP)
    f = jnp.dot(f.astype(jnp.bfloat16), w2_ref[...],
                preferred_element_type=jnp.float32) + b2_ref[...]
    o_ref[...] = (x2 + f).reshape(bb, T, D).astype(o_ref.dtype)   # residual 2


# --------------------------------- wrapper ----------------------------------
def transformer_block(x, params, num_heads, *, batch_block=1,
                      out_dtype=jnp.float32):
    B, T, D = x.shape
    head_dim = D // num_heads
    bb = min(batch_block, B)
    assert B % bb == 0

    kernel = functools.partial(transformer_block_kernel, num_heads=num_heads)

    # Fold attention scale into W_q; cast matmul weights to bf16 (MXU native,
    # half the VMEM/HBM footprint).  LN params and biases stay f32.
    wq = (params["wq"] * (1.0 / math.sqrt(head_dim))).astype(jnp.bfloat16)
    wk = params["wk"].astype(jnp.bfloat16)
    wv = params["wv"].astype(jnp.bfloat16)
    wo = params["wo"].astype(jnp.bfloat16)
    w1 = params["w1"].astype(jnp.bfloat16)
    w2 = params["w2"].astype(jnp.bfloat16)

    param_list = [
        params["ln1_scale"], params["ln1_shift"],
        wq, wk, wv, wo, params["bo"],
        params["ln2_scale"], params["ln2_shift"],
        w1, params["b1"], w2, params["b2"],
    ]

    x_spec = pl.BlockSpec((bb, T, D), lambda b: (b, 0, 0))
    out_spec = pl.BlockSpec((bb, T, D), lambda b: (b, 0, 0))

    def weight_spec(p, single_buffer):
        # grid-invariant weights/biases: block index never changes -> fetched
        # once; single-buffer them to avoid wasting 2x VMEM on dead copies.
        if single_buffer:
            return pl.BlockSpec(p.shape, lambda b: (0, 0),
                                pipeline_mode=pl.Buffered(1))
        return pl.BlockSpec(p.shape, lambda b: (0, 0))

    def build(single_buffer):
        in_specs = [x_spec] + [weight_spec(p, single_buffer) for p in param_list]
        return pl.pallas_call(
            kernel,
            out_shape=jax.ShapeDtypeStruct((B, T, D), out_dtype),
            grid_spec=pltpu.PrefetchScalarGridSpec(
                num_scalar_prefetch=0,
                grid=(B // bb,),                       # >= 2 steps -> pipelining + megacore
                in_specs=in_specs,
                out_specs=out_spec,
                scratch_shapes=[pltpu.VMEM((bb * T, D), jnp.bfloat16)],
            ),
            compiler_params=pltpu.CompilerParams(
                dimension_semantics=("parallel",),
                vmem_limit_bytes=48 * 1024 * 1024,     # fits v7x (64 MiB) as well as v5e/v6e
            ),
        )

    try:
        return build(True)(x, *param_list)
    except Exception:
        # fallback for jax versions without BlockSpec pipeline_mode support
        return build(False)(x, *param_list)


# --------------------------- pure-JAX reference ------------------------------
def reference_block(x, p, num_heads):
    def ln(t, s, b):
        m = t.mean(-1, keepdims=True)
        v = ((t - m) ** 2).mean(-1, keepdims=True)
        return s * (t - m) / jnp.sqrt(v + 1e-5) + b

    B, T, D = x.shape
    hd = D // num_heads
    h = ln(x, p["ln1_scale"], p["ln1_shift"])
    q = h @ p["wq"]
    k = h @ p["wk"]
    v = h @ p["wv"]
    q = q.reshape(B, T, num_heads, hd).transpose(0, 2, 1, 3)
    k = k.reshape(B, T, num_heads, hd).transpose(0, 2, 1, 3)
    v = v.reshape(B, T, num_heads, hd).transpose(0, 2, 1, 3)
    s = jnp.einsum("bhqd,bhkd->bhqk", q, k) / math.sqrt(hd)
    mask = jnp.triu(jnp.ones((T, T), bool), k=1)
    s = jnp.where(mask, -jnp.inf, s)
    w = jax.nn.softmax(s, axis=-1)
    ctx = jnp.einsum("bhqk,bhkd->bhqd", w, v).transpose(0, 2, 1, 3).reshape(B, T, D)
    attn = ctx @ p["wo"] + p["bo"]
    x = x + attn
    h2 = ln(x, p["ln2_scale"], p["ln2_shift"])
    f = h2 @ p["w1"] + p["b1"]
    f = 0.5 * f * (1 + jnp.tanh(math.sqrt(2 / math.pi) * (f + 0.044715 * f ** 3)))
    f = f @ p["w2"] + p["b2"]
    return x + f


# ----------------------------------- main ------------------------------------
if __name__ == "__main__":
    cfg = dict(emb_dim=32, n_heads=4, context_length=8, drop_rate=0.0, qkv_bias=False)
    B, T, D = 2, 8, cfg["emb_dim"]
    H4 = 4 * D

    key = jax.random.PRNGKey(0)
    keys = jax.random.split(key, 8)

    params = {
        "ln1_scale": jnp.ones((1, D), jnp.float32),
        "ln1_shift": jnp.zeros((1, D), jnp.float32),
        "wq": 0.05 * jax.random.normal(keys[0], (D, D), jnp.float32),
        "wk": 0.05 * jax.random.normal(keys[1], (D, D), jnp.float32),
        "wv": 0.05 * jax.random.normal(keys[2], (D, D), jnp.float32),
        "wo": 0.05 * jax.random.normal(keys[3], (D, D), jnp.float32),
        "bo": 0.01 * jax.random.normal(keys[4], (1, D), jnp.float32),
        "ln2_scale": jnp.ones((1, D), jnp.float32),
        "ln2_shift": jnp.zeros((1, D), jnp.float32),
        "w1": 0.05 * jax.random.normal(keys[5], (D, H4), jnp.float32),
        "b1": 0.01 * jax.random.normal(keys[6], (1, H4), jnp.float32),
        "w2": 0.05 * jax.random.normal(keys[7], (H4, D), jnp.float32),
        "b2": jnp.zeros((1, D), jnp.float32),
    }

    x = jax.random.normal(jax.random.PRNGKey(42), (B, T, D), jnp.float32)

    out = transformer_block(x, params, cfg["n_heads"])
    out = jax.block_until_ready(out)

    ref = reference_block(x, params, cfg["n_heads"])
    # bf16 matmuls (f32 accumulation) + approx reciprocal vs f32 reference
    np.testing.assert_allclose(np.asarray(out), np.asarray(ref), atol=2e-2, rtol=2e-2)

    print("KERNEL_OK")
</pallas_src>

<mosaic_0001>
module attributes {stable_mosaic.version = 11 : i64} {
  func.func @transformer_block_kernel(%arg0: i32, %arg1: memref<1x8x32xf32, #tpu.memory_space<vmem>>, %arg2: memref<1x32xf32, #tpu.memory_space<vmem>>, %arg3: memref<1x32xf32, #tpu.memory_space<vmem>>, %arg4: memref<32x32xbf16, #tpu.memory_space<vmem>>, %arg5: memref<32x32xbf16, #tpu.memory_space<vmem>>, %arg6: memref<32x32xbf16, #tpu.memory_space<vmem>>, %arg7: memref<32x32xbf16, #tpu.memory_space<vmem>>, %arg8: memref<1x32xf32, #tpu.memory_space<vmem>>, %arg9: memref<1x32xf32, #tpu.memory_space<vmem>>, %arg10: memref<1x32xf32, #tpu.memory_space<vmem>>, %arg11: memref<32x128xbf16, #tpu.memory_space<vmem>>, %arg12: memref<1x128xf32, #tpu.memory_space<vmem>>, %arg13: memref<128x32xbf16, #tpu.memory_space<vmem>>, %arg14: memref<1x32xf32, #tpu.memory_space<vmem>>, %arg15: memref<1x8x32xf32, #tpu.memory_space<vmem>>, %arg16: memref<8x32xbf16, #tpu.memory_space<vmem>>) attributes {dimension_semantics = [#tpu.dimension_semantics<parallel>], iteration_bounds = array<i64: 2>, scalar_prefetch = 0 : i64, scratch_operands = 1 : i64, tpu.core_type = #tpu.core_type<tc>, window_params = [{transform_indices = @transform_0, window_bounds = array<i64: 1, 8, 32>}, {pipeline_mode = #tpu.pipeline_mode<synchronous>, transform_indices = @transform_1, window_bounds = array<i64: 1, 32>}, {pipeline_mode = #tpu.pipeline_mode<synchronous>, transform_indices = @transform_2, window_bounds = array<i64: 1, 32>}, {pipeline_mode = #tpu.pipeline_mode<synchronous>, transform_indices = @transform_3, window_bounds = array<i64: 32, 32>}, {pipeline_mode = #tpu.pipeline_mode<synchronous>, transform_indices = @transform_4, window_bounds = array<i64: 32, 32>}, {pipeline_mode = #tpu.pipeline_mode<synchronous>, transform_indices = @transform_5, window_bounds = array<i64: 32, 32>}, {pipeline_mode = #tpu.pipeline_mode<synchronous>, transform_indices = @transform_6, window_bounds = array<i64: 32, 32>}, {pipeline_mode = #tpu.pipeline_mode<synchronous>, transform_indices = @transform_7, window_bounds = array<i64: 1, 32>}, {pipeline_mode = #tpu.pipeline_mode<synchronous>, transform_indices = @transform_8, window_bounds = array<i64: 1, 32>}, {pipeline_mode = #tpu.pipeline_mode<synchronous>, transform_indices = @transform_9, window_bounds = array<i64: 1, 32>}, {pipeline_mode = #tpu.pipeline_mode<synchronous>, transform_indices = @transform_10, window_bounds = array<i64: 32, 128>}, {pipeline_mode = #tpu.pipeline_mode<synchronous>, transform_indices = @transform_11, window_bounds = array<i64: 1, 128>}, {pipeline_mode = #tpu.pipeline_mode<synchronous>, transform_indices = @transform_12, window_bounds = array<i64: 128, 32>}, {pipeline_mode = #tpu.pipeline_mode<synchronous>, transform_indices = @transform_13, window_bounds = array<i64: 1, 32>}, {transform_indices = @transform_14, window_bounds = array<i64: 1, 8, 32>}]} {
    %c0 = arith.constant 0 : index
    %c0_0 = arith.constant 0 : index
    %c0_1 = arith.constant 0 : index
    %0 = vector.load %arg1[%c0, %c0_0, %c0_1] : memref<1x8x32xf32, #tpu.memory_space<vmem>>, vector<1x8x32xf32>
    %1 = vector.shape_cast %0 : vector<1x8x32xf32> to vector<8x32xf32>
    %c0_2 = arith.constant 0 : index
    %c0_3 = arith.constant 0 : index
    %2 = vector.load %arg2[%c0_2, %c0_3] : memref<1x32xf32, #tpu.memory_space<vmem>>, vector<1x32xf32>
    %c0_4 = arith.constant 0 : index
    %c0_5 = arith.constant 0 : index
    %3 = vector.load %arg3[%c0_4, %c0_5] : memref<1x32xf32, #tpu.memory_space<vmem>>, vector<1x32xf32>
    %cst = arith.constant dense<0.000000e+00> : vector<8xf32>
    %4 = vector.multi_reduction <add>, %1, %cst [1] : vector<8x32xf32> to vector<8xf32>
    %5 = vector.shape_cast %4 : vector<8xf32> to vector<8x1xf32>
    %cst_6 = arith.constant 3.200000e+01 : f32
    %6 = vector.broadcast %cst_6 : f32 to vector<8x1xf32>
    %7 = arith.divf %5, %6 : vector<8x1xf32>
    %8 = vector.broadcast %7 : vector<8x1xf32> to vector<8x32xf32>
    %9 = arith.subf %1, %8 : vector<8x32xf32>
    %10 = arith.mulf %9, %9 : vector<8x32xf32>
    %cst_7 = arith.constant dense<0.000000e+00> : vector<8xf32>
    %11 = vector.multi_reduction <add>, %10, %cst_7 [1] : vector<8x32xf32> to vector<8xf32>
    %12 = vector.shape_cast %11 : vector<8xf32> to vector<8x1xf32>
    %cst_8 = arith.constant 3.200000e+01 : f32
    %13 = vector.broadcast %cst_8 : f32 to vector<8x1xf32>
    %14 = arith.divf %12, %13 : vector<8x1xf32>
    %15 = vector.broadcast %7 : vector<8x1xf32> to vector<8x32xf32>
    %16 = arith.subf %1, %15 : vector<8x32xf32>
    %cst_9 = arith.constant 9.99999974E-6 : f32
    %17 = vector.broadcast %cst_9 : f32 to vector<8x1xf32>
    %18 = arith.addf %14, %17 : vector<8x1xf32>
    %19 = math.sqrt %18 : vector<8x1xf32>
    %20 = vector.broadcast %19 : vector<8x1xf32> to vector<8x32xf32>
    %21 = arith.divf %16, %20 : vector<8x32xf32>
    %22 = vector.broadcast %2 : vector<1x32xf32> to vector<8x32xf32>
    %23 = arith.mulf %22, %21 : vector<8x32xf32>
    %24 = vector.broadcast %3 : vector<1x32xf32> to vector<8x32xf32>
    %25 = arith.addf %23, %24 : vector<8x32xf32>
    %26 = arith.truncf %25 : vector<8x32xf32> to vector<8x32xbf16>
    %c0_10 = arith.constant 0 : index
    %c0_11 = arith.constant 0 : index
    %27 = vector.load %arg4[%c0_10, %c0_11] : memref<32x32xbf16, #tpu.memory_space<vmem>>, vector<32x32xbf16>
    %cst_12 = arith.constant dense<0.000000e+00> : vector<8x32xf32>
    %28 = tpu.matmul %26, %27, %cst_12 {dimension_numbers = #tpu.dot_dimension_numbers<[1], [0], [0], [1], [0, 0, 1, 1], [], []>} : vector<8x32xbf16>, vector<32x32xbf16>, vector<8x32xf32> -> vector<8x32xf32>
    %29 = arith.truncf %28 : vector<8x32xf32> to vector<8x32xbf16>
    %30 = vector.shape_cast %29 : vector<8x32xbf16> to vector<1x8x32xbf16>
    %c0_13 = arith.constant 0 : index
    %c0_14 = arith.constant 0 : index
    %31 = vector.load %arg5[%c0_13, %c0_14] : memref<32x32xbf16, #tpu.memory_space<vmem>>, vector<32x32xbf16>
    %cst_15 = arith.constant dense<0.000000e+00> : vector<8x32xf32>
    %32 = tpu.matmul %26, %31, %cst_15 {dimension_numbers = #tpu.dot_dimension_numbers<[1], [0], [0], [1], [0, 0, 1, 1], [], []>} : vector<8x32xbf16>, vector<32x32xbf16>, vector<8x32xf32> -> vector<8x32xf32>
    %33 = arith.truncf %32 : vector<8x32xf32> to vector<8x32xbf16>
    %34 = vector.shape_cast %33 : vector<8x32xbf16> to vector<1x8x32xbf16>
    %c0_16 = arith.constant 0 : index
    %c0_17 = arith.constant 0 : index
    %35 = vector.load %arg6[%c0_16, %c0_17] : memref<32x32xbf16, #tpu.memory_space<vmem>>, vector<32x32xbf16>
    %cst_18 = arith.constant dense<0.000000e+00> : vector<8x32xf32>
    %36 = tpu.matmul %26, %35, %cst_18 {dimension_numbers = #tpu.dot_dimension_numbers<[1], [0], [0], [1], [0, 0, 1, 1], [], []>} : vector<8x32xbf16>, vector<32x32xbf16>, vector<8x32xf32> -> vector<8x32xf32>
    %37 = arith.truncf %36 : vector<8x32xf32> to vector<8x32xbf16>
    %38 = vector.shape_cast %37 : vector<8x32xbf16> to vector<1x8x32xbf16>
    %39 = tpu.iota {dimensions = array<i32: 0>} : vector<8x8xi32>
    %40 = tpu.iota {dimensions = array<i32: 1>} : vector<8x8xi32>
    %41 = arith.cmpi sgt, %40, %39 : vector<8x8xi32>
    %cst_19 = arith.constant -1.000000e+30 : f32
    %cst_20 = arith.constant 0.000000e+00 : f32
    %42 = vector.broadcast %cst_19 : f32 to vector<8x8xf32>
    %43 = vector.broadcast %cst_20 : f32 to vector<8x8xf32>
    %44 = arith.select %41, %42, %43 : vector<8x8xi1>, vector<8x8xf32>
    %45 = vector.extract_strided_slice %30 {offsets = [0, 0, 0], sizes = [1, 8, 8], strides = [1, 1, 1]} : vector<1x8x32xbf16> to vector<1x8x8xbf16>
    %46 = vector.extract_strided_slice %34 {offsets = [0, 0, 0], sizes = [1, 8, 8], strides = [1, 1, 1]} : vector<1x8x32xbf16> to vector<1x8x8xbf16>
    %47 = vector.extract_strided_slice %38 {offsets = [0, 0, 0], sizes = [1, 8, 8], strides = [1, 1, 1]} : vector<1x8x32xbf16> to vector<1x8x8xbf16>
    "tpu.trace_start"() <{level = 10 : i32, message = "bqd,bkd->bqk"}> : () -> ()
    %cst_21 = arith.constant dense<0.000000e+00> : vector<1x8x8xf32>
    %48 = tpu.matmul %45, %46, %cst_21 {dimension_numbers = #tpu.dot_dimension_numbers<[2], [2], [1], [1], [0, 0, 0, 1, 1, 1], [0], [0]>} : vector<1x8x8xbf16>, vector<1x8x8xbf16>, vector<1x8x8xf32> -> vector<1x8x8xf32>
    "tpu.trace_stop"() : () -> ()
    %49 = vector.shape_cast %44 : vector<8x8xf32> to vector<1x8x8xf32>
    %50 = arith.addf %48, %49 : vector<1x8x8xf32>
    %cst_22 = arith.constant dense<0xFF800000> : vector<1x8xf32>
    %51 = vector.multi_reduction <maximumf>, %50, %cst_22 [2] : vector<1x8x8xf32> to vector<1x8xf32>
    %52 = vector.shape_cast %51 : vector<1x8xf32> to vector<1x8x1xf32>
    %53 = vector.broadcast %52 : vector<1x8x1xf32> to vector<1x8x8xf32>
    %54 = arith.subf %50, %53 : vector<1x8x8xf32>
    %55 = math.exp %54 : vector<1x8x8xf32>
    %cst_23 = arith.constant dense<0.000000e+00> : vector<1x8xf32>
    %56 = vector.multi_reduction <add>, %55, %cst_23 [2] : vector<1x8x8xf32> to vector<1x8xf32>
    %57 = vector.shape_cast %56 : vector<1x8xf32> to vector<1x8x1xf32>
    %58 = arith.truncf %55 : vector<1x8x8xf32> to vector<1x8x8xbf16>
    "tpu.trace_start"() <{level = 10 : i32, message = "bqk,bkd->bqd"}> : () -> ()
    %cst_24 = arith.constant dense<0.000000e+00> : vector<1x8x8xf32>
    %59 = tpu.matmul %58, %47, %cst_24 {dimension_numbers = #tpu.dot_dimension_numbers<[2], [1], [1], [2], [0, 0, 0, 1, 1, 2], [0], [0]>} : vector<1x8x8xbf16>, vector<1x8x8xbf16>, vector<1x8x8xf32> -> vector<1x8x8xf32>
    "tpu.trace_stop"() : () -> ()
    %60 = tpu.reciprocal %57 {approx = true} : vector<1x8x1xf32> -> vector<1x8x1xf32>
    %61 = vector.broadcast %60 : vector<1x8x1xf32> to vector<1x8x8xf32>
    %62 = arith.mulf %59, %61 : vector<1x8x8xf32>
    %63 = vector.shape_cast %62 : vector<1x8x8xf32> to vector<8x8xf32>
    %64 = arith.truncf %63 : vector<8x8xf32> to vector<8x8xbf16>
    %c0_25 = arith.constant 0 : index
    %c0_26 = arith.constant 0 : index
    %65 = vector.load %arg16[%c0_25, %c0_26] : memref<8x32xbf16, #tpu.memory_space<vmem>>, vector<8x8xbf16>
    tpu.vector_store %arg16[%c0_25, %c0_26], %64 {strides = array<i32>} : memref<8x32xbf16, #tpu.memory_space<vmem>>, vector<8x8xbf16>,
    %66 = vector.extract_strided_slice %30 {offsets = [0, 0, 8], sizes = [1, 8, 8], strides = [1, 1, 1]} : vector<1x8x32xbf16> to vector<1x8x8xbf16>
    %67 = vector.extract_strided_slice %34 {offsets = [0, 0, 8], sizes = [1, 8, 8], strides = [1, 1, 1]} : vector<1x8x32xbf16> to vector<1x8x8xbf16>
    %68 = vector.extract_strided_slice %38 {offsets = [0, 0, 8], sizes = [1, 8, 8], strides = [1, 1, 1]} : vector<1x8x32xbf16> to vector<1x8x8xbf16>
    "tpu.trace_start"() <{level = 10 : i32, message = "bqd,bkd->bqk"}> : () -> ()
    %cst_27 = arith.constant dense<0.000000e+00> : vector<1x8x8xf32>
    %69 = tpu.matmul %66, %67, %cst_27 {dimension_numbers = #tpu.dot_dimension_numbers<[2], [2], [1], [1], [0, 0, 0, 1, 1, 1], [0], [0]>} : vector<1x8x8xbf16>, vector<1x8x8xbf16>, vector<1x8x8xf32> -> vector<1x8x8xf32>
    "tpu.trace_stop"() : () -> ()
    %70 = vector.shape_cast %44 : vector<8x8xf32> to vector<1x8x8xf32>
    %71 = arith.addf %69, %70 : vector<1x8x8xf32>
    %cst_28 = arith.constant dense<0xFF800000> : vector<1x8xf32>
    %72 = vector.multi_reduction <maximumf>, %71, %cst_28 [2] : vector<1x8x8xf32> to vector<1x8xf32>
    %73 = vector.shape_cast %72 : vector<1x8xf32> to vector<1x8x1xf32>
    %74 = vector.broadcast %73 : vector<1x8x1xf32> to vector<1x8x8xf32>
    %75 = arith.subf %71, %74 : vector<1x8x8xf32>
    %76 = math.exp %75 : vector<1x8x8xf32>
    %cst_29 = arith.constant dense<0.000000e+00> : vector<1x8xf32>
    %77 = vector.multi_reduction <add>, %76, %cst_29 [2] : vector<1x8x8xf32> to vector<1x8xf32>
    %78 = vector.shape_cast %77 : vector<1x8xf32> to vector<1x8x1xf32>
    %79 = arith.truncf %76 : vector<1x8x8xf32> to vector<1x8x8xbf16>
    "tpu.trace_start"() <{level = 10 : i32, message = "bqk,bkd->bqd"}> : () -> ()
    %cst_30 = arith.constant dense<0.000000e+00> : vector<1x8x8xf32>
    %80 = tpu.matmul %79, %68, %cst_30 {dimension_numbers = #tpu.dot_dimension_numbers<[2], [1], [1], [2], [0, 0, 0, 1, 1, 2], [0], [0]>} : vector<1x8x8xbf16>, vector<1x8x8xbf16>, vector<1x8x8xf32> -> vector<1x8x8xf32>
    "tpu.trace_stop"() : () -> ()
    %81 = tpu.reciprocal %78 {approx = true} : vector<1x8x1xf32> -> vector<1x8x1xf32>
    %82 = vector.broadcast %81 : vector<1x8x1xf32> to vector<1x8x8xf32>
    %83 = arith.mulf %80, %82 : vector<1x8x8xf32>
    %84 = vector.shape_cast %83 : vector<1x8x8xf32> to vector<8x8xf32>
    %85 = arith.truncf %84 : vector<8x8xf32> to vector<8x8xbf16>
    %c0_31 = arith.constant 0 : index
    %c8 = arith.constant 8 : index
    %86 = vector.load %arg16[%c0_31, %c8] : memref<8x32xbf16, #tpu.memory_space<vmem>>, vector<8x8xbf16>
    tpu.vector_store %arg16[%c0_31, %c8], %85 {strides = array<i32>} : memref<8x32xbf16, #tpu.memory_space<vmem>>, vector<8x8xbf16>,
    %87 = vector.extract_strided_slice %30 {offsets = [0, 0, 16], sizes = [1, 8, 8], strides = [1, 1, 1]} : vector<1x8x32xbf16> to vector<1x8x8xbf16>
    %88 = vector.extract_strided_slice %34 {offsets = [0, 0, 16], sizes = [1, 8, 8], strides = [1, 1, 1]} : vector<1x8x32xbf16> to vector<1x8x8xbf16>
    %89 = vector.extract_strided_slice %38 {offsets = [0, 0, 16], sizes = [1, 8, 8], strides = [1, 1, 1]} : vector<1x8x32xbf16> to vector<1x8x8xbf16>
    "tpu.trace_start"() <{level = 10 : i32, message = "bqd,bkd->bqk"}> : () -> ()
    %cst_32 = arith.constant dense<0.000000e+00> : vector<1x8x8xf32>
    %90 = tpu.matmul %87, %88, %cst_32 {dimension_numbers = #tpu.dot_dimension_numbers<[2], [2], [1], [1], [0, 0, 0, 1, 1, 1], [0], [0]>} : vector<1x8x8xbf16>, vector<1x8x8xbf16>, vector<1x8x8xf32> -> vector<1x8x8xf32>
    "tpu.trace_stop"() : () -> ()
    %91 = vector.shape_cast %44 : vector<8x8xf32> to vector<1x8x8xf32>
    %92 = arith.addf %90, %91 : vector<1x8x8xf32>
    %cst_33 = arith.constant dense<0xFF800000> : vector<1x8xf32>
    %93 = vector.multi_reduction <maximumf>, %92, %cst_33 [2] : vector<1x8x8xf32> to vector<1x8xf32>
    %94 = vector.shape_cast %93 : vector<1x8xf32> to vector<1x8x1xf32>
    %95 = vector.broadcast %94 : vector<1x8x1xf32> to vector<1x8x8xf32>
    %96 = arith.subf %92, %95 : vector<1x8x8xf32>
    %97 = math.exp %96 : vector<1x8x8xf32>
    %cst_34 = arith.constant dense<0.000000e+00> : vector<1x8xf32>
    %98 = vector.multi_reduction <add>, %97, %cst_34 [2] : vector<1x8x8xf32> to vector<1x8xf32>
    %99 = vector.shape_cast %98 : vector<1x8xf32> to vector<1x8x1xf32>
    %100 = arith.truncf %97 : vector<1x8x8xf32> to vector<1x8x8xbf16>
    "tpu.trace_start"() <{level = 10 : i32, message = "bqk,bkd->bqd"}> : () -> ()
    %cst_35 = arith.constant dense<0.000000e+00> : vector<1x8x8xf32>
    %101 = tpu.matmul %100, %89, %cst_35 {dimension_numbers = #tpu.dot_dimension_numbers<[2], [1], [1], [2], [0, 0, 0, 1, 1, 2], [0], [0]>} : vector<1x8x8xbf16>, vector<1x8x8xbf16>, vector<1x8x8xf32> -> vector<1x8x8xf32>
    "tpu.trace_stop"() : () -> ()
    %102 = tpu.reciprocal %99 {approx = true} : vector<1x8x1xf32> -> vector<1x8x1xf32>
    %103 = vector.broadcast %102 : vector<1x8x1xf32> to vector<1x8x8xf32>
    %104 = arith.mulf %101, %103 : vector<1x8x8xf32>
    %105 = vector.shape_cast %104 : vector<1x8x8xf32> to vector<8x8xf32>
    %106 = arith.truncf %105 : vector<8x8xf32> to vector<8x8xbf16>
    %c0_36 = arith.constant 0 : index
    %c16 = arith.constant 16 : index
    %107 = vector.load %arg16[%c0_36, %c16] : memref<8x32xbf16, #tpu.memory_space<vmem>>, vector<8x8xbf16>
    tpu.vector_store %arg16[%c0_36, %c16], %106 {strides = array<i32>} : memref<8x32xbf16, #tpu.memory_space<vmem>>, vector<8x8xbf16>,
    %108 = vector.extract_strided_slice %30 {offsets = [0, 0, 24], sizes = [1, 8, 8], strides = [1, 1, 1]} : vector<1x8x32xbf16> to vector<1x8x8xbf16>
    %109 = vector.extract_strided_slice %34 {offsets = [0, 0, 24], sizes = [1, 8, 8], strides = [1, 1, 1]} : vector<1x8x32xbf16> to vector<1x8x8xbf16>
    %110 = vector.extract_strided_slice %38 {offsets = [0, 0, 24], sizes = [1, 8, 8], strides = [1, 1, 1]} : vector<1x8x32xbf16> to vector<1x8x8xbf16>
    "tpu.trace_start"() <{level = 10 : i32, message = "bqd,bkd->bqk"}> : () -> ()
    %cst_37 = arith.constant dense<0.000000e+00> : vector<1x8x8xf32>
    %111 = tpu.matmul %108, %109, %cst_37 {dimension_numbers = #tpu.dot_dimension_numbers<[2], [2], [1], [1], [0, 0, 0, 1, 1, 1], [0], [0]>} : vector<1x8x8xbf16>, vector<1x8x8xbf16>, vector<1x8x8xf32> -> vector<1x8x8xf32>
    "tpu.trace_stop"() : () -> ()
    %112 = vector.shape_cast %44 : vector<8x8xf32> to vector<1x8x8xf32>
    %113 = arith.addf %111, %112 : vector<1x8x8xf32>
    %cst_38 = arith.constant dense<0xFF800000> : vector<1x8xf32>
    %114 = vector.multi_reduction <maximumf>, %113, %cst_38 [2] : vector<1x8x8xf32> to vector<1x8xf32>
    %115 = vector.shape_cast %114 : vector<1x8xf32> to vector<1x8x1xf32>
    %116 = vector.broadcast %115 : vector<1x8x1xf32> to vector<1x8x8xf32>
    %117 = arith.subf %113, %116 : vector<1x8x8xf32>
    %118 = math.exp %117 : vector<1x8x8xf32>
    %cst_39 = arith.constant dense<0.000000e+00> : vector<1x8xf32>
    %119 = vector.multi_reduction <add>, %118, %cst_39 [2] : vector<1x8x8xf32> to vector<1x8xf32>
    %120 = vector.shape_cast %119 : vector<1x8xf32> to vector<1x8x1xf32>
    %121 = arith.truncf %118 : vector<1x8x8xf32> to vector<1x8x8xbf16>
    "tpu.trace_start"() <{level = 10 : i32, message = "bqk,bkd->bqd"}> : () -> ()
    %cst_40 = arith.constant dense<0.000000e+00> : vector<1x8x8xf32>
    %122 = tpu.matmul %121, %110, %cst_40 {dimension_numbers = #tpu.dot_dimension_numbers<[2], [1], [1], [2], [0, 0, 0, 1, 1, 2], [0], [0]>} : vector<1x8x8xbf16>, vector<1x8x8xbf16>, vector<1x8x8xf32> -> vector<1x8x8xf32>
    "tpu.trace_stop"() : () -> ()
    %123 = tpu.reciprocal %120 {approx = true} : vector<1x8x1xf32> -> vector<1x8x1xf32>
    %124 = vector.broadcast %123 : vector<1x8x1xf32> to vector<1x8x8xf32>
    %125 = arith.mulf %122, %124 : vector<1x8x8xf32>
    %126 = vector.shape_cast %125 : vector<1x8x8xf32> to vector<8x8xf32>
    %127 = arith.truncf %126 : vector<8x8xf32> to vector<8x8xbf16>
    %c0_41 = arith.constant 0 : index
    %c24 = arith.constant 24 : index
    %128 = vector.load %arg16[%c0_41, %c24] : memref<8x32xbf16, #tpu.memory_space<vmem>>, vector<8x8xbf16>
    tpu.vector_store %arg16[%c0_41, %c24], %127 {strides = array<i32>} : memref<8x32xbf16, #tpu.memory_space<vmem>>, vector<8x8xbf16>,
    %c0_42 = arith.constant 0 : index
    %c0_43 = arith.constant 0 : index
    %129 = vector.load %arg16[%c0_42, %c0_43] : memref<8x32xbf16, #tpu.memory_space<vmem>>, vector<8x32xbf16>
    %c0_44 = arith.constant 0 : index
    %c0_45 = arith.constant 0 : index
    %130 = vector.load %arg7[%c0_44, %c0_45] : memref<32x32xbf16, #tpu.memory_space<vmem>>, vector<32x32xbf16>
    %cst_46 = arith.constant dense<0.000000e+00> : vector<8x32xf32>
    %131 = tpu.matmul %129, %130, %cst_46 {dimension_numbers = #tpu.dot_dimension_numbers<[1], [0], [0], [1], [0, 0, 1, 1], [], []>} : vector<8x32xbf16>, vector<32x32xbf16>, vector<8x32xf32> -> vector<8x32xf32>
    %c0_47 = arith.constant 0 : index
    %c0_48 = arith.constant 0 : index
    %132 = vector.load %arg8[%c0_47, %c0_48] : memref<1x32xf32, #tpu.memory_space<vmem>>, vector<1x32xf32>
    %133 = vector.broadcast %132 : vector<1x32xf32> to vector<8x32xf32>
    %134 = arith.addf %131, %133 : vector<8x32xf32>
    %135 = arith.addf %1, %134 : vector<8x32xf32>
    %c0_49 = arith.constant 0 : index
    %c0_50 = arith.constant 0 : index
    %136 = vector.load %arg9[%c0_49, %c0_50] : memref<1x32xf32, #tpu.memory_space<vmem>>, vector<1x32xf32>
    %c0_51 = arith.constant 0 : index
    %c0_52 = arith.constant 0 : index
    %137 = vector.load %arg10[%c0_51, %c0_52] : memref<1x32xf32, #tpu.memory_space<vmem>>, vector<1x32xf32>
    %cst_53 = arith.constant dense<0.000000e+00> : vector<8xf32>
    %138 = vector.multi_reduction <add>, %135, %cst_53 [1] : vector<8x32xf32> to vector<8xf32>
    %139 = vector.shape_cast %138 : vector<8xf32> to vector<8x1xf32>
    %cst_54 = arith.constant 3.200000e+01 : f32
    %140 = vector.broadcast %cst_54 : f32 to vector<8x1xf32>
    %141 = arith.divf %139, %140 : vector<8x1xf32>
    %142 = vector.broadcast %141 : vector<8x1xf32> to vector<8x32xf32>
    %143 = arith.subf %135, %142 : vector<8x32xf32>
    %144 = arith.mulf %143, %143 : vector<8x32xf32>
    %cst_55 = arith.constant dense<0.000000e+00> : vector<8xf32>
    %145 = vector.multi_reduction <add>, %144, %cst_55 [1] : vector<8x32xf32> to vector<8xf32>
    %146 = vector.shape_cast %145 : vector<8xf32> to vector<8x1xf32>
    %cst_56 = arith.constant 3.200000e+01 : f32
    %147 = vector.broadcast %cst_56 : f32 to vector<8x1xf32>
    %148 = arith.divf %146, %147 : vector<8x1xf32>
    %149 = vector.broadcast %141 : vector<8x1xf32> to vector<8x32xf32>
    %150 = arith.subf %135, %149 : vector<8x32xf32>
    %cst_57 = arith.constant 9.99999974E-6 : f32
    %151 = vector.broadcast %cst_57 : f32 to vector<8x1xf32>
    %152 = arith.addf %148, %151 : vector<8x1xf32>
    %153 = math.sqrt %152 : vector<8x1xf32>
    %154 = vector.broadcast %153 : vector<8x1xf32> to vector<8x32xf32>
    %155 = arith.divf %150, %154 : vector<8x32xf32>
    %156 = vector.broadcast %136 : vector<1x32xf32> to vector<8x32xf32>
    %157 = arith.mulf %156, %155 : vector<8x32xf32>
    %158 = vector.broadcast %137 : vector<1x32xf32> to vector<8x32xf32>
    %159 = arith.addf %157, %158 : vector<8x32xf32>
    %160 = arith.truncf %159 : vector<8x32xf32> to vector<8x32xbf16>
    %c0_58 = arith.constant 0 : index
    %c0_59 = arith.constant 0 : index
    %161 = vector.load %arg11[%c0_58, %c0_59] : memref<32x128xbf16, #tpu.memory_space<vmem>>, vector<32x128xbf16>
    %cst_60 = arith.constant dense<0.000000e+00> : vector<8x128xf32>
    %162 = tpu.matmul %160, %161, %cst_60 {dimension_numbers = #tpu.dot_dimension_numbers<[1], [0], [0], [1], [0, 0, 1, 1], [], []>} : vector<8x32xbf16>, vector<32x128xbf16>, vector<8x128xf32> -> vector<8x128xf32>
    %c0_61 = arith.constant 0 : index
    %c0_62 = arith.constant 0 : index
    %163 = vector.load %arg12[%c0_61, %c0_62] : memref<1x128xf32, #tpu.memory_space<vmem>>, vector<1x128xf32>
    %164 = vector.broadcast %163 : vector<1x128xf32> to vector<8x128xf32>
    %165 = arith.addf %162, %164 : vector<8x128xf32>
    %cst_63 = arith.constant 5.000000e-01 : f32
    %166 = vector.broadcast %cst_63 : f32 to vector<8x128xf32>
    %167 = arith.mulf %166, %165 : vector<8x128xf32>
    %cst_64 = arith.constant 4.471500e-02 : f32
    %168 = vector.broadcast %cst_64 : f32 to vector<8x128xf32>
    %169 = arith.mulf %168, %165 : vector<8x128xf32>
    %170 = arith.mulf %169, %165 : vector<8x128xf32>
    %171 = arith.mulf %170, %165 : vector<8x128xf32>
    %172 = arith.addf %165, %171 : vector<8x128xf32>
    %cst_65 = arith.constant 0.797884583 : f32
    %173 = vector.broadcast %cst_65 : f32 to vector<8x128xf32>
    %174 = arith.mulf %173, %172 : vector<8x128xf32>
    %175 = math.tanh %174 : vector<8x128xf32>
    %cst_66 = arith.constant 1.000000e+00 : f32
    %176 = vector.broadcast %cst_66 : f32 to vector<8x128xf32>
    %177 = arith.addf %176, %175 : vector<8x128xf32>
    %178 = arith.mulf %167, %177 : vector<8x128xf32>
    %179 = arith.truncf %178 : vector<8x128xf32> to vector<8x128xbf16>
    %c0_67 = arith.constant 0 : index
    %c0_68 = arith.constant 0 : index
    %180 = vector.load %arg13[%c0_67, %c0_68] : memref<128x32xbf16, #tpu.memory_space<vmem>>, vector<128x32xbf16>
    %cst_69 = arith.constant dense<0.000000e+00> : vector<8x32xf32>
    %181 = tpu.matmul %179, %180, %cst_69 {dimension_numbers = #tpu.dot_dimension_numbers<[1], [0], [0], [1], [0, 0, 1, 1], [], []>} : vector<8x128xbf16>, vector<128x32xbf16>, vector<8x32xf32> -> vector<8x32xf32>
    %c0_70 = arith.constant 0 : index
    %c0_71 = arith.constant 0 : index
    %182 = vector.load %arg14[%c0_70, %c0_71] : memref<1x32xf32, #tpu.memory_space<vmem>>, vector<1x32xf32>
    %183 = vector.broadcast %182 : vector<1x32xf32> to vector<8x32xf32>
    %184 = arith.addf %181, %183 : vector<8x32xf32>
    %185 = arith.addf %135, %184 : vector<8x32xf32>
    %186 = vector.shape_cast %185 : vector<8x32xf32> to vector<1x8x32xf32>
    %c0_72 = arith.constant 0 : index
    %c0_73 = arith.constant 0 : index
    %c0_74 = arith.constant 0 : index
    %187 = vector.load %arg15[%c0_72, %c0_73, %c0_74] : memref<1x8x32xf32, #tpu.memory_space<vmem>>, vector<1x8x32xf32>
    tpu.vector_store %arg15[%c0_72, %c0_73, %c0_74], %186 {strides = array<i32>} : memref<1x8x32xf32, #tpu.memory_space<vmem>>, vector<1x8x32xf32>,
    return
  }
  func.func @transform_0(%arg0: i32) -> (i32, i32, i32) {
    %c0_i32 = arith.constant 0 : i32
    %c0_i32_0 = arith.constant 0 : i32
    %c0_i32_1 = arith.constant 0 : i32
    return %arg0, %c0_i32, %c0_i32_0 : i32, i32, i32
  }
  func.func @transform_1(%arg0: i32) -> (i32, i32) {
    %c0_i32 = arith.constant 0 : i32
    %c0_i32_0 = arith.constant 0 : i32
    %c0_i32_1 = arith.constant 0 : i32
    return %c0_i32, %c0_i32_0 : i32, i32
  }
  func.func @transform_2(%arg0: i32) -> (i32, i32) {
    %c0_i32 = arith.constant 0 : i32
    %c0_i32_0 = arith.constant 0 : i32
    %c0_i32_1 = arith.constant 0 : i32
    return %c0_i32, %c0_i32_0 : i32, i32
  }
  func.func @transform_3(%arg0: i32) -> (i32, i32) {
    %c0_i32 = arith.constant 0 : i32
    %c0_i32_0 = arith.constant 0 : i32
    %c0_i32_1 = arith.constant 0 : i32
    return %c0_i32, %c0_i32_0 : i32, i32
  }
  func.func @transform_4(%arg0: i32) -> (i32, i32) {
    %c0_i32 = arith.constant 0 : i32
    %c0_i32_0 = arith.constant 0 : i32
    %c0_i32_1 = arith.constant 0 : i32
    return %c0_i32, %c0_i32_0 : i32, i32
  }
  func.func @transform_5(%arg0: i32) -> (i32, i32) {
    %c0_i32 = arith.constant 0 : i32
    %c0_i32_0 = arith.constant 0 : i32
    %c0_i32_1 = arith.constant 0 : i32
    return %c0_i32, %c0_i32_0 : i32, i32
  }
  func.func @transform_6(%arg0: i32) -> (i32, i32) {
    %c0_i32 = arith.constant 0 : i32
    %c0_i32_0 = arith.constant 0 : i32
    %c0_i32_1 = arith.constant 0 : i32
    return %c0_i32, %c0_i32_0 : i32, i32
  }
  func.func @transform_7(%arg0: i32) -> (i32, i32) {
    %c0_i32 = arith.constant 0 : i32
    %c0_i32_0 = arith.constant 0 : i32
    %c0_i32_1 = arith.constant 0 : i32
    return %c0_i32, %c0_i32_0 : i32, i32
  }
  func.func @transform_8(%arg0: i32) -> (i32, i32) {
    %c0_i32 = arith.constant 0 : i32
    %c0_i32_0 = arith.constant 0 : i32
    %c0_i32_1 = arith.constant 0 : i32
    return %c0_i32, %c0_i32_0 : i32, i32
  }
  func.func @transform_9(%arg0: i32) -> (i32, i32) {
    %c0_i32 = arith.constant 0 : i32
    %c0_i32_0 = arith.constant 0 : i32
    %c0_i32_1 = arith.constant 0 : i32
    return %c0_i32, %c0_i32_0 : i32, i32
  }
  func.func @transform_10(%arg0: i32) -> (i32, i32) {
    %c0_i32 = arith.constant 0 : i32
    %c0_i32_0 = arith.constant 0 : i32
    %c0_i32_1 = arith.constant 0 : i32
    return %c0_i32, %c0_i32_0 : i32, i32
  }
  func.func @transform_11(%arg0: i32) -> (i32, i32) {
    %c0_i32 = arith.constant 0 : i32
    %c0_i32_0 = arith.constant 0 : i32
    %c0_i32_1 = arith.constant 0 : i32
    return %c0_i32, %c0_i32_0 : i32, i32
  }
  func.func @transform_12(%arg0: i32) -> (i32, i32) {
    %c0_i32 = arith.constant 0 : i32
    %c0_i32_0 = arith.constant 0 : i32
    %c0_i32_1 = arith.constant 0 : i32
    return %c0_i32, %c0_i32_0 : i32, i32
  }
  func.func @transform_13(%arg0: i32) -> (i32, i32) {
    %c0_i32 = arith.constant 0 : i32
    %c0_i32_0 = arith.constant 0 : i32
    %c0_i32_1 = arith.constant 0 : i32
    return %c0_i32, %c0_i32_0 : i32, i32
  }
  func.func @transform_14(%arg0: i32) -> (i32, i32, i32) {
    %c0_i32 = arith.constant 0 : i32
    %c0_i32_0 = arith.constant 0 : i32
    %c0_i32_1 = arith.constant 0 : i32
    return %arg0, %c0_i32, %c0_i32_0 : i32, i32, i32
  }
}

module attributes {stable_mosaic.version = 11 : i64} {
  func.func @transformer_block_kernel(%arg0: i32, %arg1: memref<1x8x32xf32, #tpu.memory_space<vmem>>, %arg2: memref<1x32xf32, #tpu.memory_space<vmem>>, %arg3: memref<1x32xf32, #tpu.memory_space<vmem>>, %arg4: memref<32x32xbf16, #tpu.memory_space<vmem>>, %arg5: memref<32x32xbf16, #tpu.memory_space<vmem>>, %arg6: memref<32x32xbf16, #tpu.memory_space<vmem>>, %arg7: memref<32x32xbf16, #tpu.memory_space<vmem>>, %arg8: memref<1x32xf32, #tpu.memory_space<vmem>>, %arg9: memref<1x32xf32, #tpu.memory_space<vmem>>, %arg10: memref<1x32xf32, #tpu.memory_space<vmem>>, %arg11: memref<32x128xbf16, #tpu.memory_space<vmem>>, %arg12: memref<1x128xf32, #tpu.memory_space<vmem>>, %arg13: memref<128x32xbf16, #tpu.memory_space<vmem>>, %arg14: memref<1x32xf32, #tpu.memory_space<vmem>>, %arg15: memref<1x8x32xf32, #tpu.memory_space<vmem>>, %arg16: memref<8x32xbf16, #tpu.memory_space<vmem>>) attributes {dimension_semantics = [#tpu.dimension_semantics<parallel>], iteration_bounds = array<i64: 2>, scalar_prefetch = 0 : i64, scratch_operands = 1 : i64, tpu.core_type = #tpu.core_type<tc>, window_params = [{transform_indices = @transform_0, window_bounds = array<i64: 1, 8, 32>}, {pipeline_mode = #tpu.pipeline_mode<synchronous>, transform_indices = @transform_1, window_bounds = array<i64: 1, 32>}, {pipeline_mode = #tpu.pipeline_mode<synchronous>, transform_indices = @transform_2, window_bounds = array<i64: 1, 32>}, {pipeline_mode = #tpu.pipeline_mode<synchronous>, transform_indices = @transform_3, window_bounds = array<i64: 32, 32>}, {pipeline_mode = #tpu.pipeline_mode<synchronous>, transform_indices = @transform_4, window_bounds = array<i64: 32, 32>}, {pipeline_mode = #tpu.pipeline_mode<synchronous>, transform_indices = @transform_5, window_bounds = array<i64: 32, 32>}, {pipeline_mode = #tpu.pipeline_mode<synchronous>, transform_indices = @transform_6, window_bounds = array<i64: 32, 32>}, {pipeline_mode = #tpu.pipeline_mode<synchronous>, transform_indices = @transform_7, window_bounds = array<i64: 1, 32>}, {pipeline_mode = #tpu.pipeline_mode<synchronous>, transform_indices = @transform_8, window_bounds = array<i64: 1, 32>}, {pipeline_mode = #tpu.pipeline_mode<synchronous>, transform_indices = @transform_9, window_bounds = array<i64: 1, 32>}, {pipeline_mode = #tpu.pipeline_mode<synchronous>, transform_indices = @transform_10, window_bounds = array<i64: 32, 128>}, {pipeline_mode = #tpu.pipeline_mode<synchronous>, transform_indices = @transform_11, window_bounds = array<i64: 1, 128>}, {pipeline_mode = #tpu.pipeline_mode<synchronous>, transform_indices = @transform_12, window_bounds = array<i64: 128, 32>}, {pipeline_mode = #tpu.pipeline_mode<synchronous>, transform_indices = @transform_13, window_bounds = array<i64: 1, 32>}, {transform_indices = @transform_14, window_bounds = array<i64: 1, 8, 32>}]} {
    %c0 = arith.constant 0 : index
    %c0_0 = arith.constant 0 : index
    %c0_1 = arith.constant 0 : index
    %0 = vector.load %arg1[%c0, %c0_0, %c0_1] : memref<1x8x32xf32, #tpu.memory_space<vmem>>, vector<1x8x32xf32>
    %1 = vector.shape_cast %0 : vector<1x8x32xf32> to vector<8x32xf32>
    %c0_2 = arith.constant 0 : index
    %c0_3 = arith.constant 0 : index
    %2 = vector.load %arg2[%c0_2, %c0_3] : memref<1x32xf32, #tpu.memory_space<vmem>>, vector<1x32xf32>
    %c0_4 = arith.constant 0 : index
    %c0_5 = arith.constant 0 : index
    %3 = vector.load %arg3[%c0_4, %c0_5] : memref<1x32xf32, #tpu.memory_space<vmem>>, vector<1x32xf32>
    %cst = arith.constant dense<0.000000e+00> : vector<8xf32>
    %4 = vector.multi_reduction <add>, %1, %cst [1] : vector<8x32xf32> to vector<8xf32>
    %5 = vector.shape_cast %4 : vector<8xf32> to vector<8x1xf32>
    %cst_6 = arith.constant 3.200000e+01 : f32
    %6 = vector.broadcast %cst_6 : f32 to vector<8x1xf32>
    %7 = arith.divf %5, %6 : vector<8x1xf32>
    %8 = vector.broadcast %7 : vector<8x1xf32> to vector<8x32xf32>
    %9 = arith.subf %1, %8 : vector<8x32xf32>
    %10 = arith.mulf %9, %9 : vector<8x32xf32>
    %cst_7 = arith.constant dense<0.000000e+00> : vector<8xf32>
    %11 = vector.multi_reduction <add>, %10, %cst_7 [1] : vector<8x32xf32> to vector<8xf32>
    %12 = vector.shape_cast %11 : vector<8xf32> to vector<8x1xf32>
    %cst_8 = arith.constant 3.200000e+01 : f32
    %13 = vector.broadcast %cst_8 : f32 to vector<8x1xf32>
    %14 = arith.divf %12, %13 : vector<8x1xf32>
    %15 = vector.broadcast %7 : vector<8x1xf32> to vector<8x32xf32>
    %16 = arith.subf %1, %15 : vector<8x32xf32>
    %cst_9 = arith.constant 9.99999974E-6 : f32
    %17 = vector.broadcast %cst_9 : f32 to vector<8x1xf32>
    %18 = arith.addf %14, %17 : vector<8x1xf32>
    %19 = math.sqrt %18 : vector<8x1xf32>
    %20 = vector.broadcast %19 : vector<8x1xf32> to vector<8x32xf32>
    %21 = arith.divf %16, %20 : vector<8x32xf32>
    %22 = vector.broadcast %2 : vector<1x32xf32> to vector<8x32xf32>
    %23 = arith.mulf %22, %21 : vector<8x32xf32>
    %24 = vector.broadcast %3 : vector<1x32xf32> to vector<8x32xf32>
    %25 = arith.addf %23, %24 : vector<8x32xf32>
    %26 = arith.truncf %25 : vector<8x32xf32> to vector<8x32xbf16>
    %c0_10 = arith.constant 0 : index
    %c0_11 = arith.constant 0 : index
    %27 = vector.load %arg4[%c0_10, %c0_11] : memref<32x32xbf16, #tpu.memory_space<vmem>>, vector<32x32xbf16>
    %cst_12 = arith.constant dense<0.000000e+00> : vector<8x32xf32>
    %28 = tpu.matmul %26, %27, %cst_12 {dimension_numbers = #tpu.dot_dimension_numbers<[1], [0], [0], [1], [0, 0, 1, 1], [], []>} : vector<8x32xbf16>, vector<32x32xbf16>, vector<8x32xf32> -> vector<8x32xf32>
    %29 = arith.truncf %28 : vector<8x32xf32> to vector<8x32xbf16>
    %30 = vector.shape_cast %29 : vector<8x32xbf16> to vector<1x8x32xbf16>
    %c0_13 = arith.constant 0 : index
    %c0_14 = arith.constant 0 : index
    %31 = vector.load %arg5[%c0_13, %c0_14] : memref<32x32xbf16, #tpu.memory_space<vmem>>, vector<32x32xbf16>
    %cst_15 = arith.constant dense<0.000000e+00> : vector<8x32xf32>
    %32 = tpu.matmul %26, %31, %cst_15 {dimension_numbers = #tpu.dot_dimension_numbers<[1], [0], [0], [1], [0, 0, 1, 1], [], []>} : vector<8x32xbf16>, vector<32x32xbf16>, vector<8x32xf32> -> vector<8x32xf32>
    %33 = arith.truncf %32 : vector<8x32xf32> to vector<8x32xbf16>
    %34 = vector.shape_cast %33 : vector<8x32xbf16> to vector<1x8x32xbf16>
    %c0_16 = arith.constant 0 : index
    %c0_17 = arith.constant 0 : index
    %35 = vector.load %arg6[%c0_16, %c0_17] : memref<32x32xbf16, #tpu.memory_space<vmem>>, vector<32x32xbf16>
    %cst_18 = arith.constant dense<0.000000e+00> : vector<8x32xf32>
    %36 = tpu.matmul %26, %35, %cst_18 {dimension_numbers = #tpu.dot_dimension_numbers<[1], [0], [0], [1], [0, 0, 1, 1], [], []>} : vector<8x32xbf16>, vector<32x32xbf16>, vector<8x32xf32> -> vector<8x32xf32>
    %37 = arith.truncf %36 : vector<8x32xf32> to vector<8x32xbf16>
    %38 = vector.shape_cast %37 : vector<8x32xbf16> to vector<1x8x32xbf16>
    %39 = tpu.iota {dimensions = array<i32: 0>} : vector<8x8xi32>
    %40 = tpu.iota {dimensions = array<i32: 1>} : vector<8x8xi32>
    %41 = arith.cmpi sgt, %40, %39 : vector<8x8xi32>
    %cst_19 = arith.constant -1.000000e+30 : f32
    %cst_20 = arith.constant 0.000000e+00 : f32
    %42 = vector.broadcast %cst_19 : f32 to vector<8x8xf32>
    %43 = vector.broadcast %cst_20 : f32 to vector<8x8xf32>
    %44 = arith.select %41, %42, %43 : vector<8x8xi1>, vector<8x8xf32>
    %45 = vector.extract_strided_slice %30 {offsets = [0, 0, 0], sizes = [1, 8, 8], strides = [1, 1, 1]} : vector<1x8x32xbf16> to vector<1x8x8xbf16>
    %46 = vector.extract_strided_slice %34 {offsets = [0, 0, 0], sizes = [1, 8, 8], strides = [1, 1, 1]} : vector<1x8x32xbf16> to vector<1x8x8xbf16>
    %47 = vector.extract_strided_slice %38 {offsets = [0, 0, 0], sizes = [1, 8, 8], strides = [1, 1, 1]} : vector<1x8x32xbf16> to vector<1x8x8xbf16>
    "tpu.trace_start"() <{level = 10 : i32, message = "bqd,bkd->bqk"}> : () -> ()
    %cst_21 = arith.constant dense<0.000000e+00> : vector<1x8x8xf32>
    %48 = tpu.matmul %45, %46, %cst_21 {dimension_numbers = #tpu.dot_dimension_numbers<[2], [2], [1], [1], [0, 0, 0, 1, 1, 1], [0], [0]>} : vector<1x8x8xbf16>, vector<1x8x8xbf16>, vector<1x8x8xf32> -> vector<1x8x8xf32>
    "tpu.trace_stop"() : () -> ()
    %49 = vector.shape_cast %44 : vector<8x8xf32> to vector<1x8x8xf32>
    %50 = arith.addf %48, %49 : vector<1x8x8xf32>
    %cst_22 = arith.constant dense<0xFF800000> : vector<1x8xf32>
    %51 = vector.multi_reduction <maximumf>, %50, %cst_22 [2] : vector<1x8x8xf32> to vector<1x8xf32>
    %52 = vector.shape_cast %51 : vector<1x8xf32> to vector<1x8x1xf32>
    %53 = vector.broadcast %52 : vector<1x8x1xf32> to vector<1x8x8xf32>
    %54 = arith.subf %50, %53 : vector<1x8x8xf32>
    %55 = math.exp %54 : vector<1x8x8xf32>
    %cst_23 = arith.constant dense<0.000000e+00> : vector<1x8xf32>
    %56 = vector.multi_reduction <add>, %55, %cst_23 [2] : vector<1x8x8xf32> to vector<1x8xf32>
    %57 = vector.shape_cast %56 : vector<1x8xf32> to vector<1x8x1xf32>
    %58 = arith.truncf %55 : vector<1x8x8xf32> to vector<1x8x8xbf16>
    "tpu.trace_start"() <{level = 10 : i32, message = "bqk,bkd->bqd"}> : () -> ()
    %cst_24 = arith.constant dense<0.000000e+00> : vector<1x8x8xf32>
    %59 = tpu.matmul %58, %47, %cst_24 {dimension_numbers = #tpu.dot_dimension_numbers<[2], [1], [1], [2], [0, 0, 0, 1, 1, 2], [0], [0]>} : vector<1x8x8xbf16>, vector<1x8x8xbf16>, vector<1x8x8xf32> -> vector<1x8x8xf32>
    "tpu.trace_stop"() : () -> ()
    %60 = tpu.reciprocal %57 {approx = true} : vector<1x8x1xf32> -> vector<1x8x1xf32>
    %61 = vector.broadcast %60 : vector<1x8x1xf32> to vector<1x8x8xf32>
    %62 = arith.mulf %59, %61 : vector<1x8x8xf32>
    %63 = vector.shape_cast %62 : vector<1x8x8xf32> to vector<8x8xf32>
    %64 = arith.truncf %63 : vector<8x8xf32> to vector<8x8xbf16>
    %c0_25 = arith.constant 0 : index
    %c0_26 = arith.constant 0 : index
    %65 = vector.load %arg16[%c0_25, %c0_26] : memref<8x32xbf16, #tpu.memory_space<vmem>>, vector<8x8xbf16>
    tpu.vector_store %arg16[%c0_25, %c0_26], %64 {strides = array<i32>} : memref<8x32xbf16, #tpu.memory_space<vmem>>, vector<8x8xbf16>,
    %66 = vector.extract_strided_slice %30 {offsets = [0, 0, 8], sizes = [1, 8, 8], strides = [1, 1, 1]} : vector<1x8x32xbf16> to vector<1x8x8xbf16>
    %67 = vector.extract_strided_slice %34 {offsets = [0, 0, 8], sizes = [1, 8, 8], strides = [1, 1, 1]} : vector<1x8x32xbf16> to vector<1x8x8xbf16>
    %68 = vector.extract_strided_slice %38 {offsets = [0, 0, 8], sizes = [1, 8, 8], strides = [1, 1, 1]} : vector<1x8x32xbf16> to vector<1x8x8xbf16>
    "tpu.trace_start"() <{level = 10 : i32, message = "bqd,bkd->bqk"}> : () -> ()
    %cst_27 = arith.constant dense<0.000000e+00> : vector<1x8x8xf32>
    %69 = tpu.matmul %66, %67, %cst_27 {dimension_numbers = #tpu.dot_dimension_numbers<[2], [2], [1], [1], [0, 0, 0, 1, 1, 1], [0], [0]>} : vector<1x8x8xbf16>, vector<1x8x8xbf16>, vector<1x8x8xf32> -> vector<1x8x8xf32>
    "tpu.trace_stop"() : () -> ()
    %70 = vector.shape_cast %44 : vector<8x8xf32> to vector<1x8x8xf32>
    %71 = arith.addf %69, %70 : vector<1x8x8xf32>
    %cst_28 = arith.constant dense<0xFF800000> : vector<1x8xf32>
    %72 = vector.multi_reduction <maximumf>, %71, %cst_28 [2] : vector<1x8x8xf32> to vector<1x8xf32>
    %73 = vector.shape_cast %72 : vector<1x8xf32> to vector<1x8x1xf32>
    %74 = vector.broadcast %73 : vector<1x8x1xf32> to vector<1x8x8xf32>
    %75 = arith.subf %71, %74 : vector<1x8x8xf32>
    %76 = math.exp %75 : vector<1x8x8xf32>
    %cst_29 = arith.constant dense<0.000000e+00> : vector<1x8xf32>
    %77 = vector.multi_reduction <add>, %76, %cst_29 [2] : vector<1x8x8xf32> to vector<1x8xf32>
    %78 = vector.shape_cast %77 : vector<1x8xf32> to vector<1x8x1xf32>
    %79 = arith.truncf %76 : vector<1x8x8xf32> to vector<1x8x8xbf16>
    "tpu.trace_start"() <{level = 10 : i32, message = "bqk,bkd->bqd"}> : () -> ()
    %cst_30 = arith.constant dense<0.000000e+00> : vector<1x8x8xf32>
    %80 = tpu.matmul %79, %68, %cst_30 {dimension_numbers = #tpu.dot_dimension_numbers<[2], [1], [1], [2], [0, 0, 0, 1, 1, 2], [0], [0]>} : vector<1x8x8xbf16>, vector<1x8x8xbf16>, vector<1x8x8xf32> -> vector<1x8x8xf32>
    "tpu.trace_stop"() : () -> ()
    %81 = tpu.reciprocal %78 {approx = true} : vector<1x8x1xf32> -> vector<1x8x1xf32>
    %82 = vector.broadcast %81 : vector<1x8x1xf32> to vector<1x8x8xf32>
    %83 = arith.mulf %80, %82 : vector<1x8x8xf32>
    %84 = vector.shape_cast %83 : vector<1x8x8xf32> to vector<8x8xf32>
    %85 = arith.truncf %84 : vector<8x8xf32> to vector<8x8xbf16>
    %c0_31 = arith.constant 0 : index
    %c8 = arith.constant 8 : index
    %86 = vector.load %arg16[%c0_31, %c8] : memref<8x32xbf16, #tpu.memory_space<vmem>>, vector<8x8xbf16>
    tpu.vector_store %arg16[%c0_31, %c8], %85 {strides = array<i32>} : memref<8x32xbf16, #tpu.memory_space<vmem>>, vector<8x8xbf16>,
    %87 = vector.extract_strided_slice %30 {offsets = [0, 0, 16], sizes = [1, 8, 8], strides = [1, 1, 1]} : vector<1x8x32xbf16> to vector<1x8x8xbf16>
    %88 = vector.extract_strided_slice %34 {offsets = [0, 0, 16], sizes = [1, 8, 8], strides = [1, 1, 1]} : vector<1x8x32xbf16> to vector<1x8x8xbf16>
    %89 = vector.extract_strided_slice %38 {offsets = [0, 0, 16], sizes = [1, 8, 8], strides = [1, 1, 1]} : vector<1x8x32xbf16> to vector<1x8x8xbf16>
    "tpu.trace_start"() <{level = 10 : i32, message = "bqd,bkd->bqk"}> : () -> ()
    %cst_32 = arith.constant dense<0.000000e+00> : vector<1x8x8xf32>
    %90 = tpu.matmul %87, %88, %cst_32 {dimension_numbers = #tpu.dot_dimension_numbers<[2], [2], [1], [1], [0, 0, 0, 1, 1, 1], [0], [0]>} : vector<1x8x8xbf16>, vector<1x8x8xbf16>, vector<1x8x8xf32> -> vector<1x8x8xf32>
    "tpu.trace_stop"() : () -> ()
    %91 = vector.shape_cast %44 : vector<8x8xf32> to vector<1x8x8xf32>
    %92 = arith.addf %90, %91 : vector<1x8x8xf32>
    %cst_33 = arith.constant dense<0xFF800000> : vector<1x8xf32>
    %93 = vector.multi_reduction <maximumf>, %92, %cst_33 [2] : vector<1x8x8xf32> to vector<1x8xf32>
    %94 = vector.shape_cast %93 : vector<1x8xf32> to vector<1x8x1xf32>
    %95 = vector.broadcast %94 : vector<1x8x1xf32> to vector<1x8x8xf32>
    %96 = arith.subf %92, %95 : vector<1x8x8xf32>
    %97 = math.exp %96 : vector<1x8x8xf32>
    %cst_34 = arith.constant dense<0.000000e+00> : vector<1x8xf32>
    %98 = vector.multi_reduction <add>, %97, %cst_34 [2] : vector<1x8x8xf32> to vector<1x8xf32>
    %99 = vector.shape_cast %98 : vector<1x8xf32> to vector<1x8x1xf32>
    %100 = arith.truncf %97 : vector<1x8x8xf32> to vector<1x8x8xbf16>
    "tpu.trace_start"() <{level = 10 : i32, message = "bqk,bkd->bqd"}> : () -> ()
    %cst_35 = arith.constant dense<0.000000e+00> : vector<1x8x8xf32>
    %101 = tpu.matmul %100, %89, %cst_35 {dimension_numbers = #tpu.dot_dimension_numbers<[2], [1], [1], [2], [0, 0, 0, 1, 1, 2], [0], [0]>} : vector<1x8x8xbf16>, vector<1x8x8xbf16>, vector<1x8x8xf32> -> vector<1x8x8xf32>
    "tpu.trace_stop"() : () -> ()
    %102 = tpu.reciprocal %99 {approx = true} : vector<1x8x1xf32> -> vector<1x8x1xf32>
    %103 = vector.broadcast %102 : vector<1x8x1xf32> to vector<1x8x8xf32>
    %104 = arith.mulf %101, %103 : vector<1x8x8xf32>
    %105 = vector.shape_cast %104 : vector<1x8x8xf32> to vector<8x8xf32>
    %106 = arith.truncf %105 : vector<8x8xf32> to vector<8x8xbf16>
    %c0_36 = arith.constant 0 : index
    %c16 = arith.constant 16 : index
    %107 = vector.load %arg16[%c0_36, %c16] : memref<8x32xbf16, #tpu.memory_space<vmem>>, vector<8x8xbf16>
    tpu.vector_store %arg16[%c0_36, %c16], %106 {strides = array<i32>} : memref<8x32xbf16, #tpu.memory_space<vmem>>, vector<8x8xbf16>,
    %108 = vector.extract_strided_slice %30 {offsets = [0, 0, 24], sizes = [1, 8, 8], strides = [1, 1, 1]} : vector<1x8x32xbf16> to vector<1x8x8xbf16>
    %109 = vector.extract_strided_slice %34 {offsets = [0, 0, 24], sizes = [1, 8, 8], strides = [1, 1, 1]} : vector<1x8x32xbf16> to vector<1x8x8xbf16>
    %110 = vector.extract_strided_slice %38 {offsets = [0, 0, 24], sizes = [1, 8, 8], strides = [1, 1, 1]} : vector<1x8x32xbf16> to vector<1x8x8xbf16>
    "tpu.trace_start"() <{level = 10 : i32, message = "bqd,bkd->bqk"}> : () -> ()
    %cst_37 = arith.constant dense<0.000000e+00> : vector<1x8x8xf32>
    %111 = tpu.matmul %108, %109, %cst_37 {dimension_numbers = #tpu.dot_dimension_numbers<[2], [2], [1], [1], [0, 0, 0, 1, 1, 1], [0], [0]>} : vector<1x8x8xbf16>, vector<1x8x8xbf16>, vector<1x8x8xf32> -> vector<1x8x8xf32>
    "tpu.trace_stop"() : () -> ()
    %112 = vector.shape_cast %44 : vector<8x8xf32> to vector<1x8x8xf32>
    %113 = arith.addf %111, %112 : vector<1x8x8xf32>
    %cst_38 = arith.constant dense<0xFF800000> : vector<1x8xf32>
    %114 = vector.multi_reduction <maximumf>, %113, %cst_38 [2] : vector<1x8x8xf32> to vector<1x8xf32>
    %115 = vector.shape_cast %114 : vector<1x8xf32> to vector<1x8x1xf32>
    %116 = vector.broadcast %115 : vector<1x8x1xf32> to vector<1x8x8xf32>
    %117 = arith.subf %113, %116 : vector<1x8x8xf32>
    %118 = math.exp %117 : vector<1x8x8xf32>
    %cst_39 = arith.constant dense<0.000000e+00> : vector<1x8xf32>
    %119 = vector.multi_reduction <add>, %118, %cst_39 [2] : vector<1x8x8xf32> to vector<1x8xf32>
    %120 = vector.shape_cast %119 : vector<1x8xf32> to vector<1x8x1xf32>
    %121 = arith.truncf %118 : vector<1x8x8xf32> to vector<1x8x8xbf16>
    "tpu.trace_start"() <{level = 10 : i32, message = "bqk,bkd->bqd"}> : () -> ()
    %cst_40 = arith.constant dense<0.000000e+00> : vector<1x8x8xf32>
    %122 = tpu.matmul %121, %110, %cst_40 {dimension_numbers = #tpu.dot_dimension_numbers<[2], [1], [1], [2], [0, 0, 0, 1, 1, 2], [0], [0]>} : vector<1x8x8xbf16>, vector<1x8x8xbf16>, vector<1x8x8xf32> -> vector<1x8x8xf32>
    "tpu.trace_stop"() : () -> ()
    %123 = tpu.reciprocal %120 {approx = true} : vector<1x8x1xf32> -> vector<1x8x1xf32>
    %124 = vector.broadcast %123 : vector<1x8x1xf32> to vector<1x8x8xf32>
    %125 = arith.mulf %122, %124 : vector<1x8x8xf32>
    %126 = vector.shape_cast %125 : vector<1x8x8xf32> to vector<8x8xf32>
    %127 = arith.truncf %126 : vector<8x8xf32> to vector<8x8xbf16>
    %c0_41 = arith.constant 0 : index
    %c24 = arith.constant 24 : index
    %128 = vector.load %arg16[%c0_41, %c24] : memref<8x32xbf16, #tpu.memory_space<vmem>>, vector<8x8xbf16>
    tpu.vector_store %arg16[%c0_41, %c24], %127 {strides = array<i32>} : memref<8x32xbf16, #tpu.memory_space<vmem>>, vector<8x8xbf16>,
    %c0_42 = arith.constant 0 : index
    %c0_43 = arith.constant 0 : index
    %129 = vector.load %arg16[%c0_42, %c0_43] : memref<8x32xbf16, #tpu.memory_space<vmem>>, vector<8x32xbf16>
    %c0_44 = arith.constant 0 : index
    %c0_45 = arith.constant 0 : index
    %130 = vector.load %arg7[%c0_44, %c0_45] : memref<32x32xbf16, #tpu.memory_space<vmem>>, vector<32x32xbf16>
    %cst_46 = arith.constant dense<0.000000e+00> : vector<8x32xf32>
    %131 = tpu.matmul %129, %130, %cst_46 {dimension_numbers = #tpu.dot_dimension_numbers<[1], [0], [0], [1], [0, 0, 1, 1], [], []>} : vector<8x32xbf16>, vector<32x32xbf16>, vector<8x32xf32> -> vector<8x32xf32>
    %c0_47 = arith.constant 0 : index
    %c0_48 = arith.constant 0 : index
    %132 = vector.load %arg8[%c0_47, %c0_48] : memref<1x32xf32, #tpu.memory_space<vmem>>, vector<1x32xf32>
    %133 = vector.broadcast %132 : vector<1x32xf32> to vector<8x32xf32>
    %134 = arith.addf %131, %133 : vector<8x32xf32>
    %135 = arith.addf %1, %134 : vector<8x32xf32>
    %c0_49 = arith.constant 0 : index
    %c0_50 = arith.constant 0 : index
    %136 = vector.load %arg9[%c0_49, %c0_50] : memref<1x32xf32, #tpu.memory_space<vmem>>, vector<1x32xf32>
    %c0_51 = arith.constant 0 : index
    %c0_52 = arith.constant 0 : index
    %137 = vector.load %arg10[%c0_51, %c0_52] : memref<1x32xf32, #tpu.memory_space<vmem>>, vector<1x32xf32>
    %cst_53 = arith.constant dense<0.000000e+00> : vector<8xf32>
    %138 = vector.multi_reduction <add>, %135, %cst_53 [1] : vector<8x32xf32> to vector<8xf32>
    %139 = vector.shape_cast %138 : vector<8xf32> to vector<8x1xf32>
    %cst_54 = arith.constant 3.200000e+01 : f32
    %140 = vector.broadcast %cst_54 : f32 to vector<8x1xf32>
    %141 = arith.divf %139, %140 : vector<8x1xf32>
    %142 = vector.broadcast %141 : vector<8x1xf32> to vector<8x32xf32>
    %143 = arith.subf %135, %142 : vector<8x32xf32>
    %144 = arith.mulf %143, %143 : vector<8x32xf32>
    %cst_55 = arith.constant dense<0.000000e+00> : vector<8xf32>
    %145 = vector.multi_reduction <add>, %144, %cst_55 [1] : vector<8x32xf32> to vector<8xf32>
    %146 = vector.shape_cast %145 : vector<8xf32> to vector<8x1xf32>
    %cst_56 = arith.constant 3.200000e+01 : f32
    %147 = vector.broadcast %cst_56 : f32 to vector<8x1xf32>
    %148 = arith.divf %146, %147 : vector<8x1xf32>
    %149 = vector.broadcast %141 : vector<8x1xf32> to vector<8x32xf32>
    %150 = arith.subf %135, %149 : vector<8x32xf32>
    %cst_57 = arith.constant 9.99999974E-6 : f32
    %151 = vector.broadcast %cst_57 : f32 to vector<8x1xf32>
    %152 = arith.addf %148, %151 : vector<8x1xf32>
    %153 = math.sqrt %152 : vector<8x1xf32>
    %154 = vector.broadcast %153 : vector<8x1xf32> to vector<8x32xf32>
    %155 = arith.divf %150, %154 : vector<8x32xf32>
    %156 = vector.broadcast %136 : vector<1x32xf32> to vector<8x32xf32>
    %157 = arith.mulf %156, %155 : vector<8x32xf32>
    %158 = vector.broadcast %137 : vector<1x32xf32> to vector<8x32xf32>
    %159 = arith.addf %157, %158 : vector<8x32xf32>
    %160 = arith.truncf %159 : vector<8x32xf32> to vector<8x32xbf16>
    %c0_58 = arith.constant 0 : index
    %c0_59 = arith.constant 0 : index
    %161 = vector.load %arg11[%c0_58, %c0_59] : memref<32x128xbf16, #tpu.memory_space<vmem>>, vector<32x128xbf16>
    %cst_60 = arith.constant dense<0.000000e+00> : vector<8x128xf32>
    %162 = tpu.matmul %160, %161, %cst_60 {dimension_numbers = #tpu.dot_dimension_numbers<[1], [0], [0], [1], [0, 0, 1, 1], [], []>} : vector<8x32xbf16>, vector<32x128xbf16>, vector<8x128xf32> -> vector<8x128xf32>
    %c0_61 = arith.constant 0 : index
    %c0_62 = arith.constant 0 : index
    %163 = vector.load %arg12[%c0_61, %c0_62] : memref<1x128xf32, #tpu.memory_space<vmem>>, vector<1x128xf32>
    %164 = vector.broadcast %163 : vector<1x128xf32> to vector<8x128xf32>
    %165 = arith.addf %162, %164 : vector<8x128xf32>
    %cst_63 = arith.constant 5.000000e-01 : f32
    %166 = vector.broadcast %cst_63 : f32 to vector<8x128xf32>
    %167 = arith.mulf %166, %165 : vector<8x128xf32>
    %cst_64 = arith.constant 4.471500e-02 : f32
    %168 = vector.broadcast %cst_64 : f32 to vector<8x128xf32>
    %169 = arith.mulf %168, %165 : vector<8x128xf32>
    %170 = arith.mulf %169, %165 : vector<8x128xf32>
    %171 = arith.mulf %170, %165 : vector<8x128xf32>
    %172 = arith.addf %165, %171 : vector<8x128xf32>
    %cst_65 = arith.constant 0.797884583 : f32
    %173 = vector.broadcast %cst_65 : f32 to vector<8x128xf32>
    %174 = arith.mulf %173, %172 : vector<8x128xf32>
    %175 = math.tanh %174 : vector<8x128xf32>
    %cst_66 = arith.constant 1.000000e+00 : f32
    %176 = vector.broadcast %cst_66 : f32 to vector<8x128xf32>
    %177 = arith.addf %176, %175 : vector<8x128xf32>
    %178 = arith.mulf %167, %177 : vector<8x128xf32>
    %179 = arith.truncf %178 : vector<8x128xf32> to vector<8x128xbf16>
    %c0_67 = arith.constant 0 : index
    %c0_68 = arith.constant 0 : index
    %180 = vector.load %arg13[%c0_67, %c0_68] : memref<128x32xbf16, #tpu.memory_space<vmem>>, vector<128x32xbf16>
    %cst_69 = arith.constant dense<0.000000e+00> : vector<8x32xf32>
    %181 = tpu.matmul %179, %180, %cst_69 {dimension_numbers = #tpu.dot_dimension_numbers<[1], [0], [0], [1], [0, 0, 1, 1], [], []>} : vector<8x128xbf16>, vector<128x32xbf16>, vector<8x32xf32> -> vector<8x32xf32>
    %c0_70 = arith.constant 0 : index
    %c0_71 = arith.constant 0 : index
    %182 = vector.load %arg14[%c0_70, %c0_71] : memref<1x32xf32, #tpu.memory_space<vmem>>, vector<1x32xf32>
    %183 = vector.broadcast %182 : vector<1x32xf32> to vector<8x32xf32>
    %184 = arith.addf %181, %183 : vector<8x32xf32>
    %185 = arith.addf %135, %184 : vector<8x32xf32>
    %186 = vector.shape_cast %185 : vector<8x32xf32> to vector<1x8x32xf32>
    %c0_72 = arith.constant 0 : index
    %c0_73 = arith.constant 0 : index
    %c0_74 = arith.constant 0 : index
    %187 = vector.load %arg15[%c0_72, %c0_73, %c0_74] : memref<1x8x32xf32, #tpu.memory_space<vmem>>, vector<1x8x32xf32>
    tpu.vector_store %arg15[%c0_72, %c0_73, %c0_74], %186 {strides = array<i32>} : memref<1x8x32xf32, #tpu.memory_space<vmem>>, vector<1x8x32xf32>,
    return
  }
  func.func @transform_0(%arg0: i32) -> (i32, i32, i32) {
    %c0_i32 = arith.constant 0 : i32
    %c0_i32_0 = arith.constant 0 : i32
    %c0_i32_1 = arith.constant 0 : i32
    return %arg0, %c0_i32, %c0_i32_0 : i32, i32, i32
  }
  func.func @transform_1(%arg0: i32) -> (i32, i32) {
    %c0_i32 = arith.constant 0 : i32
    %c0_i32_0 = arith.constant 0 : i32
    %c0_i32_1 = arith.constant 0 : i32
    return %c0_i32, %c0_i32_0 : i32, i32
  }
  func.func @transform_2(%arg0: i32) -> (i32, i32) {
    %c0_i32 = arith.constant 0 : i32
    %c0_i32_0 = arith.constant 0 : i32
    %c0_i32_1 = arith.constant 0 : i32
    return %c0_i32, %c0_i32_0 : i32, i32
  }
  func.func @transform_3(%arg0: i32) -> (i32, i32) {
    %c0_i32 = arith.constant 0 : i32
    %c0_i32_0 = arith.constant 0 : i32
    %c0_i32_1 = arith.constant 0 : i32
    return %c0_i32, %c0_i32_0 : i32, i32
  }
  func.func @transform_4(%arg0: i32) -> (i32, i32) {
    %c0_i32 = arith.constant 0 : i32
    %c0_i32_0 = arith.constant 0 : i32
    %c0_i32_1 = arith.constant 0 : i32
    return %c0_i32, %c0_i32_0 : i32, i32
  }
  func.func @transform_5(%arg0: i32) -> (i32, i32) {
    %c0_i32 = arith.constant 0 : i32
    %c0_i32_0 = arith.constant 0 : i32
    %c0_i32_1 = arith.constant 0 : i32
    return %c0_i32, %c0_i32_0 : i32, i32
  }
  func.func @transform_6(%arg0: i32) -> (i32, i32) {
    %c0_i32 = arith.constant 0 : i32
    %c0_i32_0 = arith.constant 0 : i32
    %c0_i32_1 = arith.constant 0 : i32
    return %c0_i32, %c0_i32_0 : i32, i32
  }
  func.func @transform_7(%arg0: i32) -> (i32, i32) {
    %c0_i32 = arith.constant 0 : i32
    %c0_i32_0 = arith.constant 0 : i32
    %c0_i32_1 = arith.constant 0 : i32
    return %c0_i32, %c0_i32_0 : i32, i32
  }
  func.func @transform_8(%arg0: i32) -> (i32, i32) {
    %c0_i32 = arith.constant 0 : i32
    %c0_i32_0 = arith.constant 0 : i32
    %c0_i32_1 = arith.constant 0 : i32
    return %c0_i32, %c0_i32_0 : i32, i32
  }
  func.func @transform_9(%arg0: i32) -> (i32, i32) {
    %c0_i32 = arith.constant 0 : i32
    %c0_i32_0 = arith.constant 0 : i32
    %c0_i32_1 = arith.constant 0 : i32
    return %c0_i32, %c0_i32_0 : i32, i32
  }
  func.func @transform_10(%arg0: i32) -> (i32, i32) {
    %c0_i32 = arith.constant 0 : i32
    %c0_i32_0 = arith.constant 0 : i32
    %c0_i32_1 = arith.constant 0 : i32
    return %c0_i32, %c0_i32_0 : i32, i32
  }
  func.func @transform_11(%arg0: i32) -> (i32, i32) {
    %c0_i32 = arith.constant 0 : i32
    %c0_i32_0 = arith.constant 0 : i32
    %c0_i32_1 = arith.constant 0 : i32
    return %c0_i32, %c0_i32_0 : i32, i32
  }
  func.func @transform_12(%arg0: i32) -> (i32, i32) {
    %c0_i32 = arith.constant 0 : i32
    %c0_i32_0 = arith.constant 0 : i32
    %c0_i32_1 = arith.constant 0 : i32
    return %c0_i32, %c0_i32_0 : i32, i32
  }
  func.func @transform_13(%arg0: i32) -> (i32, i32) {
    %c0_i32 = arith.constant 0 : i32
    %c0_i32_0 = arith.constant 0 : i32
    %c0_i32_1 = arith.constant 0 : i32
    return %c0_i32, %c0_i32_0 : i32, i32
  }
  func.func @transform_14(%arg0: i32) -> (i32, i32, i32) {
    %c0_i32 = arith.constant 0 : i32
    %c0_i32_0 = arith.constant 0 : i32
    %c0_i32_1 = arith.constant 0 : i32
    return %arg0, %c0_i32, %c0_i32_0 : i32, i32, i32
  }
}

</mosaic_0001>

<bundles_post_ra>
// kernel: tpu_custom_call.1
= control target key start
LH: loop header
LB: loop body
LE: loop exit
PB: predicated region body
PF: predicated region fallthrough
CT: control target
= control target key end

     0   :  { %s2541_s0 = inlined_call_operand.vmem [shape: f32[2,8,32], index: 0, kind: input, shape index: {}]   ;;  %s2542_s1 = inlined_call_operand.vmem [shape: f32[1,32], index: 1, kind: input, shape index: {}]   ;;  %s2543_s2 = inlined_call_operand.vmem [shape: f32[1,32], index: 2, kind: input, shape index: {}]   ;;  %s2544_s3 = inlined_call_operand.vmem [shape: bf16[32,32], index: 3, kind: input, shape index: {}]   ;;  %s2545_s4 = inlined_call_operand.vmem [shape: bf16[32,32], index: 4, kind: input, shape index: {}]   ;;  %s2546_s5 = inlined_call_operand.vmem [shape: bf16[32,32], index: 5, kind: input, shape index: {}]   ;;  %s2547_s6 = inlined_call_operand.vmem [shape: bf16[32,32], index: 6, kind: input, shape index: {}]   ;;  %s2548_s7 = inlined_call_operand.hbm [shape: f32[1,32], index: 7, kind: input, shape index: {}]   ;;  %s2549_s8 = inlined_call_operand.hbm [shape: f32[1,32], index: 8, kind: input, shape index: {}]   ;;  %s2550_s9 = inlined_call_operand.hbm [shape: f32[1,32], index: 9, kind: input, shape index: {}]   ;;  %s2551_s10 = inlined_call_operand.vmem [shape: bf16[32,128], index: 10, kind: input, shape index: {}]   ;;  %s2552_s11 = inlined_call_operand.vmem [shape: f32[1,128], index: 11, kind: input, shape index: {}]   ;;  %s2553_s12 = inlined_call_operand.vmem [shape: bf16[128,32], index: 12, kind: input, shape index: {}]   ;;  %s2554_s13 = inlined_call_operand.vmem [shape: f32[1,32], index: 13, kind: input, shape index: {}]   ;;  %s2555_s14 = inlined_call_operand.hbm [shape: f32[2,8,32], index: 14, kind: output, shape index: {}]  }
   0x1   :  { %2568 = sst [smem:[#allocation20_spill]] %s2555_s14 }
   0x2   :  { %19 = vsyncpa [#allocation4], 0 }
   0x3   :  { %20 = vsyncpa [#allocation7], 0 }
   0x4   :  { %21 = vsyncpa [#allocation5], 0 }
   0x5   :  { %23 = vsyncpa [#allocation5 + $0x1], 0  ;;  %s2162_s29 = smov 0   ;;  %s2164_s30 = smov 0  }
   0x6   :  { %s2166_s15 = smov 0   ;;  %s2168_s16 = smov 0  }
   0x7 LB: > { %2569 = sst [smem:[#allocation13_spill]] %s2061_s29  ;;  %s2183_s17 = sadd.s32 4294967295, %s2073_s16   ;;  %s2073_s16 = sphi %s2168_s16, %s2593_s16   ;;  %s2069_s15 = sphi %s2166_s15, %s2598_s15   ;;  %s2065_s30 = sphi %s2164_s30, %s2597_s30   ;;  %s2061_s29 = sphi %s2162_s29, %s2596_s29  }
   0x8   : > { %2570 = sst [smem:[#allocation14_spill]] %s2069_s15  ;;  %s1589_s18 = sadd.s32 4294967294, %s2073_s16  }
   0x9   : > { %2571 = sst [smem:[#allocation15_spill]] %s2073_s16  ;;  %s2187_s19 = sadd.s32 1, %s2073_s16  }
   0xa   : > { %2572 = sst [smem:[#allocation16_spill]] %s2187_s19  ;;  %s335_s20 = sadd.s32 1, %s2069_s15 }
   0xb   : > { %s332_s21 = ssub.s32 %s2073_s16, %s2187_s19  ;;  %p345_p0 = scmp.ne.s32.totalorder %s2069_s15, %s2065_s30 }
   0xc   : > { %p333_p1 = scmp.eq.s32.totalorder %s332_s21, 0  ;;  %p346_p2 = scmp.eq.s32.totalorder %s2183_s17, 1 }
   0xd   : > { %p351_p3 = scmp.ne.s32.totalorder %s2065_s30, %s2061_s29  ;;  %p352_p4 = scmp.eq.s32.totalorder %s1589_s18, 1 }
   0xe   : > { %s2198_s22 = scalar_select %p333_p1, %s2069_s15, %s335_s20  }
   0xf   : > { %p2200_p5 = por %p346_p2, %p345_p0  ;;  %p2204_p6 = por %p352_p4, %p351_p3 }
  0x10   : > { %2573 = sst [smem:[#allocation17_spill]] %s2198_s22  ;;  %p1590_p7 = scmp.ge.s32.totalorder %s2073_s16, 1 }
  0x11   : > { %s2574_s23 = scalar_select %p2200_p5, 1, 0 }
  0x12   : > { %s2576_s24 = scalar_select %p2204_p6, 1, 0 }
  0x13   : > { %2575 = sst [smem:[#allocation18_spill]] %s2574_s23  ;;  %p359_p8 = scmp.lt.s32.totalorder %s2073_s16, 3 }
  0x14   : > { %2577 = sst [smem:[#allocation19_spill]] %s2576_s24  ;;  %p2562_p9 = scmp.eq.s32.totalorder %s2183_s17, 0 }
  0x15   : > { %p2211_p10 = pnand %p1590_p7, %p359_p8  ;;  %s2075_s26 = smov [#allocation6]  }
  0x16   : > { %s401_s27 = sshll.u32 %s2075_s26, 4  ;;  %s2076_s28 = smov [#allocation3]   ;;  %s402_s27 = int_to_ptr.vmem [resolvable:$true] %s401_s27 }
  0x17   : > { %s2578_s25 = scalar_select %p2211_p10, 1, 0 }
  0x18   : > { %p1811_p11 = pneg %p2211_p10  ;;  %s390_s18 = sshll.u32 %s2076_s28, 4  ;;  %s2223_s18 = int_to_ptr.vmem [resolvable:$true] %s390_s18 }
  0x19   : > { %s2077_s21 = smov [#allocation8]   ;;  %s1919_s26 = scalar_lea.hbm %s2549_s8, 16 }
  0x1a   : > { %p2219_p12 = pnand %p2562_p9, %p1811_p11  ;;  %s412_s22 = sshll.u32 %s2077_s21, 4  ;;  %s2225_s22 = int_to_ptr.vmem [resolvable:$true] %s412_s22 }
  0x1b   : > { %p1920_p13 = scmp.ne.s32.totalorder %s2549_s8, %s1919_s26  ;;  %p1926_p3 = scmp.lt.u32.totalorder %s1919_s26, %s2549_s8 }
  0x1c   : > { %p2235_p0 = pneg %p2219_p12 }
  0x1e   : > { %p1922_p1 = pnand %p2235_p0, %p1920_p13 }
  0x20   : > { %p1923_p2 = pneg %p1922_p1 }
  0x22   : > { %p1928_p4 = pnand %p1926_p3, %p1923_p2 }
  0x24   : > { %1931 = shalt.err (!%p1928_p4)
}
  0x25   : > { %s1932_s15 = scalar_lea.vmem %s402_s27, 16  ;;  %s1939_s29 = scalar_lea.vmem %s402_s27, 32 }
  0x26   : > { %p1933_p7 = scmp.ne.s32.totalorder %s402_s27, %s1932_s15  ;;  %p1940_p9 = scmp.lt.s32.totalorder %s402_s27, %s402_s27 }
  0x27   : > { %p1941_p6 = scmp.lt.s32.totalorder %s1939_s29, %s1932_s15 }
  0x28   : > { %p1935_p8 = pnand %p1933_p7, %p2235_p0 }
  0x29   : > { %p1942_p5 = por %p1941_p6, %p1940_p9 }
  0x2a   : > { %p1936_p11 = pneg %p1935_p8 }
  0x2c   : > { %p1943_p10 = pnand %p1942_p5, %p1936_p11 }
  0x2e   : > { %1946 = shalt.err (!%p1943_p10)
}
  0x2f   : > { %1817 = dma.hbm_to_vmem [thread:$0]  (!%p2219_p12), %s2549_s8, 16, %s402_s27, [#allocation7]  }
  0x30   : > { %s1947_s21 = scalar_lea.hbm %s2548_s7, 16 }
  0x31   : > { %p1948_p13 = scmp.ne.s32.totalorder %s2548_s7, %s1947_s21  ;;  %p1954_p5 = scmp.lt.u32.totalorder %s1947_s21, %s2548_s7 }
  0x33   : > { %p1950_p1 = pnand %p1948_p13, %p2235_p0 }
  0x35   : > { %p1951_p6 = pneg %p1950_p1 }
  0x37   : > { %p1956_p9 = pnand %p1954_p5, %p1951_p6 }
  0x39   : > { %1959 = shalt.err (!%p1956_p9)
}
  0x3a   : > { %s1960_s27 = scalar_lea.vmem %s2223_s18, 16  ;;  %s1967_s14 = scalar_lea.vmem %s2223_s18, 32 }
  0x3b   : > { %p1961_p10 = scmp.ne.s32.totalorder %s2223_s18, %s1960_s27  ;;  %p1968_p4 = scmp.lt.s32.totalorder %s2223_s18, %s2223_s18 }
  0x3c   : > { %p1969_p7 = scmp.lt.s32.totalorder %s1967_s14, %s1960_s27 }
  0x3d   : > { %p1963_p2 = pnand %p1961_p10, %p2235_p0 }
  0x3e   : > { %p1970_p8 = por %p1969_p7, %p1968_p4 }
  0x3f   : > { %p1964_p3 = pneg %p1963_p2 }
  0x41   : > { %p1971_p11 = pnand %p1970_p8, %p1964_p3 }
  0x43   : > { %1974 = shalt.err (!%p1971_p11)
}
  0x44   : > { %1814 = dma.hbm_to_vmem [thread:$0]  (!%p2219_p12), %s2548_s7, 16, %s2223_s18, [#allocation4]  }
  0x45   : > { %s1975_s26 = scalar_lea.hbm %s2550_s9, 16 }
  0x46   : > { %p1976_p13 = scmp.ne.s32.totalorder %s2550_s9, %s1975_s26  ;;  %p1982_p5 = scmp.lt.u32.totalorder %s1975_s26, %s2550_s9 }
  0x48   : > { %p1978_p1 = pnand %p1976_p13, %p2235_p0 }
  0x4a   : > { %p1979_p6 = pneg %p1978_p1 }
  0x4c   : > { %p1984_p9 = pnand %p1982_p5, %p1979_p6 }
  0x4e   : > { %1987 = shalt.err (!%p1984_p9)
}
  0x4f   : > { %s1988_s18 = scalar_lea.vmem %s2225_s22, 16  ;;  %s1995_s14 = scalar_lea.vmem %s2225_s22, 32 }
  0x50   : > { %p1989_p10 = scmp.ne.s32.totalorder %s2225_s22, %s1988_s18  ;;  %p1996_p4 = scmp.lt.s32.totalorder %s2225_s22, %s2225_s22 }
  0x51   : > { %p1997_p7 = scmp.lt.s32.totalorder %s1995_s14, %s1988_s18 }
  0x52   : > { %p1991_p2 = pnand %p1989_p10, %p2235_p0 }
  0x53   : > { %p1998_p8 = por %p1997_p7, %p1996_p4 }
  0x54   : > { %p1992_p3 = pneg %p1991_p2 }
  0x56   : > { %p1999_p11 = pnand %p1998_p8, %p1992_p3 }
  0x58   : > { %2002 = shalt.err (!%p1999_p11)
}
  0x59   : > { %1820 = dma.hbm_to_vmem [thread:$0]  (!%p2219_p12), %s2550_s9, 16, %s2225_s22, [#allocation7]  }
  0x5a   : > { %p2581_p13 = scmp.ne.s32.totalorder %s2578_s25, 0 }
  0x5b   : > { %p2582_p0 = scmp.eq.s32.totalorder (!%p2581_p13), %s2183_s17, 0 }
  0x5c   : > { %444 = sbr.rel (%p2581_p13) target bundleno = 2531 (0x9e3), region = 76 }
  0x63   : > { %2048 = dma.done.wait (%p2582_p0), [#allocation4], 16   ;;  %p2583_p1 = pmov %p2582_p0 }
  0x64   : > { %p2584_p6 = pmov %p2582_p0 }
  0x65   : > { %2050 = vsyncadd (%p2583_p1), [#allocation4], 4294967280 }
  0x66   : > { %2052 = dma.done.wait (%p2584_p6), [#allocation7], 32   ;;  %p2585_p5 = pmov %p2582_p0 }
  0x67   : > { %p497_p9 = scmp.lt.s32.totalorder %s2183_s17, 1  ;;  %vm505_vm0 = vcmask 261120   ;;  %v1875_v7 = vld [vmem:[%s2544_s3] sm:$0xff]   ;;  %v2078_v8 = vmov 0.0   ;;  %vm2079_vm1 = vmmov 0   ;;  %v1876_v9 = vld [vmem:[%s2544_s3 + $0x8] sm:$0xff]   ;;  %v716_v55 = vlaneseq }
  0x68   : > { %2054 = vsyncadd (%p2585_p5), [#allocation7], 4294967264  ;;  %1689 = vmatprep.subr.bf16.mxu0 %v2078_v8  ;;  %1693 = vmatprep.mubr.msk.bf16.mxu0 %vm2079_vm1, %v2078_v8  ;;  %v1601_v19 = vld [vmem:[%s2542_s1] ss:$0 sm:$0xff]  ;;  %v1878_v26 = vld [vmem:[%s2545_s4 + $0x8] sm:$0xff]   ;;  %vm722_vm4 = vcmask 64512  }
  0x69   : > { %s498_s20 = scalar_select %p497_p9, %s2183_s17, 1  ;;  %1690 = vmatpush3.bf16.msra.mxu0 %v1875_v7  ;;  %1713 = vmatprep.subr.bf16.mxu1 %v2078_v8  ;;  %v1602_v21 = vld [vmem:[%s2543_s2] ss:$0 sm:$0xff]  ;;  %v1880_v28 = vld [vmem:[%s2546_s5 + $0x8] sm:$0xff]   ;;  %vm782_vm5 = vcmask 1043456   ;;  %v717_v56 = vshrl.u32 %v716_v55, 7 }
  0x6a   : > { %1691 = vmatprep.subr.bf16.mxu0 %v2078_v8  ;;  %1715 = vmatprep.mubr.msk.bf16.mxu1 %vm2079_vm1, %v2078_v8  ;;  %v1877_v24 = vld [vmem:[%s2545_s4] sm:$0xff]   ;;  %s2080_s26 = smov 112   ;;  %s2081_s21 = smov 120   ;;  %v719_v57 = vand.u32 127, %v716_v55  ;;  %vm829_vm7 = vcmask 60416   ;;  %vm951_vm8 = vcmask 126016  }
  0x6b   : > { %s1600_s22 = sshll.u32 %s498_s20, 3  ;;  %v1879_v27 = vld [vmem:[%s2546_s5] sm:$0xff]   ;;  %s2082_s15 = smov 104   ;;  %vm1070_vm9 = vcmask 191616   ;;  %vm1189_vm10 = vcmask 257216  }
  0x6c   : > { %s500_s24 = scalar_lea.vmem %s2541_s0, %s1600_s22  ;;  %vm720_vm6 = vcmp.gt.s32.totalorder %v719_v57, %v717_v56  ;;  %s2083_s29 = smov 8  }
  0x6d   : > { %v2314_v0 = vld [vmem:[%s500_s24] sm:$0xff]  ;;  %1692 = vmatpush3.bf16.msra.mxu0 %v1876_v9  ;;  %v721_v58 = vsel %vm720_vm6, -1e+30, %v2078_v8  ;;  %s2084_s19 = smov 16   ;;  %s2085_s20 = smov 24  }
  0x6e   : > { %v506_v1 = vsel %vm505_vm0, %v2314_v0, 0.0  ;;  %1697 = vmatprep.subr.bf16.mxu0 %v2078_v8  ;;  %s2586_s14 = sld [smem:[#allocation18_spill]]  ;;  %s1643_s23 = sshll.u32 %s2183_s17, 7 }
  0x6f   : > { %507 = vadd.xlane.f32.xlu0 %v506_v1  ;;  %s2587_s25 = sld [smem:[#allocation20_spill]] }
  0x74   : > { %p2588_p10 = scmp.ne.s32.totalorder %s2586_s14, 0 }
  0x75   : > { %s2498_s24 = scalar_lea.hbm %s2587_s25, %s1643_s23 }
  0xfc   : > { %v508_v2 = vpop.xlane.xlu0 %507 }
  0xfd   : > { %v510_v3 = vmul.f32 0.03125, %v508_v2 }
  0xff   : > { %v511_v4 = vsub.f32 %v2314_v0, %v510_v3 }
 0x101   : > { %v512_v5 = vmul.f32 %v511_v4, %v511_v4 }
 0x103   : > { %v513_v6 = vsel %vm505_vm0, %v512_v5, 0.0 }
 0x104   : > { %514 = vadd.xlane.f32.xlu0 %v513_v6 }
 0x191   : > { %v515_v10 = vpop.xlane.xlu0 %514 }
 0x192   : > { %v516_v11 = vmul.f32 0.03125, %v515_v10 }
 0x194   : > { %v517_v12 = vadd.f32 1e-05, %v516_v11 }
 0x196   : > { %1893 = vrsqrt.f32 %v517_v12  ;;  %vm520_vm2 = vcmp.eq.f32.partialorder %v517_v12, inf  ;;  %v523_v15 = vand.u32 2147483648, %v517_v12  ;;  %vm522_vm3 = vcmp.eq.f32.partialorder %v517_v12, 0.0 }
 0x1a0   : > { %v1894_v13 = vpop.eup %1893 }
 0x1a1   : > { %v519_v14 = vmul.f32 %v1894_v13, %v517_v12 }
 0x1a3   : > { %v521_v16 = vsel %vm520_vm2, %v517_v12, %v519_v14 }
 0x1a4   : > { %v524_v17 = vsel %vm522_vm3, %v523_v15, %v521_v16 }
 0x1a5   : > { %1895 = vrcp.f32 %v524_v17 }
 0x1af   : > { %v1896_v18 = vpop.eup %1895 }
 0x1b0   : > { %v526_v20 = vmul.f32 %v1896_v18, %v511_v4 }
 0x1b2   : > { %v533_v22 = vmul.f32 %v1601_v19, %v526_v20 }
 0x1b4   : > { %v540_v23 = vadd.f32 %v1602_v21, %v533_v22 }
 0x1b6   : > { %v541_v25 = vpack.c.bf16 %v540_v23, %v540_v23 }
 0x1b8   : > { %1694 = vmatmul.mubr.msk.bf16.vlgmr.msra.gmra.mrb[0].mxu0 %vm505_vm0, %v541_v25 }
 0x1b9   : > { %1698 = vmatpush3.bf16.msra.mxu0 %v1877_v24  ;;  %1701 = vmatprep.mubr.msk.bf16.mxu0 %vm2079_vm1, %v2078_v8 }
 0x1ba   : > { %1699 = vmatprep.subr.bf16.mxu0 %v2078_v8 }
 0x1bd   : > { %1700 = vmatpush3.bf16.msra.mxu0 %v1878_v26 }
 0x1be   : > { %1705 = vmatprep.subr.bf16.mxu0 %v2078_v8 }
 0x1c0   : > { %1702 = vmatmul.mubr.msk.bf16.vlgmr.msra.gmra.mrb[4].mxu0 %vm505_vm0, %v541_v25 }
 0x1c1   : > { %1706 = vmatpush3.bf16.msra.mxu0 %v1879_v27  ;;  %1709 = vmatprep.mubr.msk.bf16.mxu0 %vm2079_vm1, %v2078_v8 }
 0x1c2   : > { %1707 = vmatprep.subr.bf16.mxu0 %v2078_v8 }
 0x1c5   : > { %1708 = vmatpush3.bf16.msra.mxu0 %v1880_v28 }
 0x1c6   : > { %1719 = vmatprep.subr.bf16.mxu0 %v2078_v8 }
 0x1c8   : > { %1710 = vmatmul.mubr.msk.bf16.vlgmr.msra.gmra.mrb[8].mxu0 %vm505_vm0, %v541_v25 }
 0x1c9   : > { %1721 = vmatprep.mubr.msk.bf16.mxu0 %vm2079_vm1, %v2078_v8 }
 0x28b   : > { %v595_v29 = vpop.f32.mrb[0].mxu0 }
 0x28c   : > { %v1695_v30 = vpop.f32.mrb[1].mxu0  ;;  %v601_v39 = vpack.c.bf16 %v595_v29, %v595_v29 }
 0x28d   : > { %v598_v31 = vpop.f32.mrb[2].mxu0 }
 0x28e   : > { %v1696_v32 = vpop.f32.mrb[3].mxu0 }
 0x293   : > { %v652_v33 = vpop.f32.mrb[4].mxu0 }
 0x294   : > { %v658_v34 = vpack.c.bf16 %v652_v33, %v652_v33  ;;  %v1703_v35 = vpop.f32.mrb[5].mxu0 }
 0x295   : > { %v655_v36 = vpop.f32.mrb[6].mxu0 }
 0x296   : > { %955 = vrot.lane.b32.xlu0 %v658_v34, %s2080_s26  ;;  %835 = vrot.lane.b32.xlu1 %v658_v34, %s2081_s21  ;;  %v1704_v37 = vpop.f32.mrb[7].mxu0  ;;  %v727_v38 = vsel %vm722_vm4, %v658_v34, 0 }
 0x297   : > { %1714 = vmatpush3.bf16.xpose.msra.mxu1 %v727_v38 }
 0x298   : > { %1725 = vmatprep.subr.bf16.mxu1 %v2078_v8 }
 0x29a   : > { %832 = vrot.lane.b32.xlu1 %v601_v39, %s2081_s21 }
 0x29b   : > { %v709_v40 = vpop.f32.mrb[8].mxu0 }
 0x29c   : > { %v2370_v41 = vpack.c.bf16 %v709_v40, %v709_v40  ;;  %v1711_v42 = vpop.f32.mrb[9].mxu0 }
 0x29d   : > { %v712_v43 = vpop.f32.mrb[10].mxu0 }
 0x29e   : > { %953 = vrot.lane.b32.xlu1 %v601_v39, %s2080_s26  ;;  %v1712_v44 = vpop.f32.mrb[11].mxu0  ;;  %1716 = vmatmul.mubr.msk.bf16.vlgmr.msra.gmra.mrb[0].mxu1 %vm722_vm4, %v601_v39  ;;  %v784_v45 = vsel %vm782_vm5, %v2370_v41, 0 }
 0x29f   : > { %1720 = vmatpush3.bf16.msra.mxu0 %v784_v45  ;;  %1727 = vmatprep.mubr.msk.bf16.mxu1 %vm2079_vm1, %v2078_v8 }
 0x2a0   : > { %1731 = vmatprep.subr.bf16.mxu0 %v2078_v8 }
 0x2a2   : > { %1074 = vrot.lane.b32.xlu1 %v658_v34, %s2082_s15 }
 0x2a6   : > { %1072 = vrot.lane.b32.xlu1 %v601_v39, %s2082_s15 }
 0x308   : > { %v836_v46 = vpop.permute.xlu1 %835  ;;  %v956_v49 = vpop.permute.xlu0 %955 }
 0x309   : > { %v841_v47 = vsel %vm722_vm4, %v836_v46, 0  ;;  %v961_v51 = vsel %vm722_vm4, %v956_v49, 0 }
 0x30a   : > { %1726 = vmatpush3.bf16.xpose.msra.mxu1 %v841_v47 }
 0x30b   : > { %1737 = vmatprep.subr.bf16.mxu1 %v2078_v8 }
 0x30c   : > { %v833_v48 = vpop.permute.xlu1 %832 }
 0x310   : > { %v954_v50 = vpop.permute.xlu1 %953 }
 0x311   : > { %1728 = vmatmul.mubr.msk.bf16.vlgmr.msra.gmra.mrb[4].mxu1 %vm722_vm4, %v833_v48 }
 0x312   : > { %1738 = vmatpush3.bf16.xpose.msra.mxu1 %v961_v51  ;;  %1739 = vmatprep.mubr.msk.bf16.mxu1 %vm2079_vm1, %v2078_v8 }
 0x313   : > { %1749 = vmatprep.subr.bf16.mxu1 %v2078_v8 }
 0x314   : > { %v1075_v52 = vpop.permute.xlu1 %1074 }
 0x315   : > { %v1080_v53 = vsel %vm722_vm4, %v1075_v52, 0 }
 0x318   : > { %v1073_v54 = vpop.permute.xlu1 %1072 }
 0x319   : > { %1740 = vmatmul.mubr.msk.bf16.vlgmr.msra.gmra.mrb[8].mxu1 %vm722_vm4, %v954_v50 }
 0x31a   : > { %1750 = vmatpush3.bf16.xpose.msra.mxu1 %v1080_v53  ;;  %1751 = vmatprep.mubr.msk.bf16.mxu1 %vm2079_vm1, %v2078_v8 }
 0x31b   : > { %1761 = vmatprep.subr.bf16.mxu1 %v2078_v8 }
 0x321   : > { %1752 = vmatmul.mubr.msk.bf16.vlgmr.msra.gmra.mrb[12].mxu1 %vm722_vm4, %v1073_v54 }
 0x322   : > { %1765 = vmatprep.mubr.msk.bf16.mxu1 %vm2079_vm1, %v2078_v8 }
 0x371   : > { %v763_v59 = vpop.f32.mrb[0].mxu1 }
 0x372   : > { %v764_v60 = vadd.f32 %v763_v59, %v721_v58  ;;  %v1717_v61 = vpop.f32.mrb[1].mxu1 }
 0x373   : > { %v766_v62 = vpop.f32.mrb[2].mxu1 }
 0x374   : > { %v1718_v63 = vpop.f32.mrb[3].mxu1  ;;  %v769_v1 = vsel %vm722_vm4, %v764_v60, -inf }
 0x375   : > { %770 = vmax.xlane.f32.xlu1 %v769_v1 }
 0x386   : > { %1013 = vrot.lane.b32.xlu1 %v2370_v41, %s2080_s26  ;;  %s2086_s26 = smov [#allocation9]  }
 0x3e4   : > { %v877_v2 = vpop.f32.mrb[4].mxu1 }
 0x3e5   : > { %v878_v3 = vadd.f32 %v877_v2, %v721_v58  ;;  %v1729_v4 = vpop.f32.mrb[5].mxu1 }
 0x3e6   : > { %v880_v5 = vpop.f32.mrb[6].mxu1 }
 0x3e7   : > { %v1730_v6 = vpop.f32.mrb[7].mxu1  ;;  %v883_v7 = vsel %vm722_vm4, %v878_v3, -inf }
 0x3e8   : > { %884 = vmax.xlane.f32.xlu0 %v883_v7 }
 0x3ec   : > { %v997_v9 = vpop.f32.mrb[8].mxu1 }
 0x3ed   : > { %v998_v10 = vadd.f32 %v997_v9, %v721_v58  ;;  %v1741_v11 = vpop.f32.mrb[9].mxu1  ;;  %v1881_v9 = vld [vmem:[%s2547_s6] sm:$0xff]  }
 0x3ee   : > { %v1000_v12 = vpop.f32.mrb[10].mxu1  ;;  %1762 = vmatpush3.bf16.msra.mxu1 %v1881_v9 }
 0x3ef   : > { %v1742_v13 = vpop.f32.mrb[11].mxu1  ;;  %v1003_v14 = vsel %vm722_vm4, %v998_v10, -inf  ;;  %1763 = vmatprep.subr.bf16.mxu1 %v2078_v8 }
 0x3f0   : > { %1004 = vmax.xlane.f32.xlu1 %v1003_v14  ;;  %v1882_v13 = vld [vmem:[%s2547_s6 + $0x8] sm:$0xff]  }
 0x3f2   : > { %1764 = vmatpush3.bf16.msra.mxu1 %v1882_v13 }
 0x3f3   : > { %1777 = vmatprep.subr.bf16.mxu1 %v2078_v8 }
 0x3f4   : > { %v1116_v15 = vpop.f32.mrb[12].mxu1 }
 0x3f5   : > { %v1117_v16 = vadd.f32 %v1116_v15, %v721_v58  ;;  %v1753_v17 = vpop.f32.mrb[13].mxu1 }
 0x3f6   : > { %v1119_v18 = vpop.f32.mrb[14].mxu1 }
 0x3f7   : > { %v1754_v19 = vpop.f32.mrb[15].mxu1  ;;  %v1122_v20 = vsel %vm722_vm4, %v1117_v16, -inf }
 0x3f8   : > { %1123 = vmax.xlane.f32.xlu1 %v1122_v20 }
 0x3fe   : > { %894 = vrot.lane.b32.xlu0 %v2370_v41, %s2081_s21  ;;  %s2007_s21 = sshll.u32 %s2086_s26, 4  ;;  %s2008_s21 = int_to_ptr.vmem [resolvable:$false] %s2007_s21 }
 0x402   : > { %v771_v21 = vpop.xlane.xlu1 %770 }
 0x403   : > { %v772_v22 = vsub.f32 %v764_v60, %v771_v21 }
 0x405   : > { %v773_v23 = vmul.f32 1.442695, %v772_v22 }
 0x406   : > { %v1014_v29 = vpop.permute.xlu1 %1013 }
 0x407   : > { %1897 = vpow2.f32 %v773_v23  ;;  %v1019_v40 = vsel %vm782_vm5, %v1014_v29, 0 }
 0x409   : > { %1132 = vrot.lane.b32.xlu1 %v2370_v41, %s2082_s15  ;;  %s494_s15 = sand.u32 1, %s2065_s30  }
 0x40a   : > { %s1486_s17 = scalar_lea.sflag [#allocation5], %s494_s15 }
 0x411   : > { %v1898_v24 = vpop.eup %1897 }
 0x412   : > { %v778_v25 = vpack.c.bf16 %v1898_v24, %v1898_v24  ;;  %v775_v50 = vsel %vm722_vm4, %v1898_v24, 0.0 }
 0x414   : > { %1722 = vmatmul.mubr.msk.bf16.vlgmr.msra.gmra.mrb[12].mxu0 %vm722_vm4, %v778_v25 }
 0x415   : > { %1733 = vmatprep.mubr.msk.bf16.mxu0 %vm2079_vm1, %v2078_v8 }
 0x475   : > { %v885_v26 = vpop.xlane.xlu0 %884 }
 0x476   : > { %v886_v27 = vsub.f32 %v878_v3, %v885_v26 }
 0x478   : > { %v887_v28 = vmul.f32 1.442695, %v886_v27  ;;  %v1623_v27 = vld [vmem:[#allocation3] ss:$0 sm:$0xff] }
 0x479   : > { %v895_v30 = vpop.permute.xlu0 %894 }
 0x47a   : > { %1899 = vpow2.f32 %v887_v28  ;;  %v900_v31 = vsel %vm782_vm5, %v895_v30, 0 }
 0x47b   : > { %1732 = vmatpush3.bf16.msra.mxu0 %v900_v31 }
 0x47c   : > { %1743 = vmatprep.subr.bf16.mxu0 %v2078_v8 }
 0x47d   : > { %v1005_v32 = vpop.xlane.xlu1 %1004 }
 0x47e   : > { %v1006_v33 = vsub.f32 %v998_v10, %v1005_v32 }
 0x480   : > { %v1007_v34 = vmul.f32 1.442695, %v1006_v33 }
 0x482   : > { %1901 = vpow2.f32 %v1007_v34 }
 0x484   : > { %v1900_v35 = vpop.eup %1899 }
 0x485   : > { %v1124_v36 = vpop.xlane.xlu1 %1123  ;;  %v889_v37 = vsel %vm722_vm4, %v1900_v35, 0.0  ;;  %v892_v38 = vpack.c.bf16 %v1900_v35, %v1900_v35 }
 0x486   : > { %v1125_v39 = vsub.f32 %v1117_v16, %v1124_v36  ;;  %890 = vadd.xlane.f32.xlu0 %v889_v37 }
 0x487   : > { %1734 = vmatmul.mubr.msk.bf16.vlgmr.msra.gmra.mrb[16].mxu0 %vm722_vm4, %v892_v38 }
 0x488   : > { %v1126_v41 = vmul.f32 1.442695, %v1125_v39  ;;  %1744 = vmatpush3.bf16.msra.mxu0 %v1019_v40  ;;  %1745 = vmatprep.mubr.msk.bf16.mxu0 %vm2079_vm1, %v2078_v8  ;;  %v1883_v40 = vld [vmem:[%s2551_s10] sm:$0xff]  }
 0x489   : > { %1755 = vmatprep.subr.bf16.mxu0 %v2078_v8  ;;  %v1133_v43 = vpop.permute.xlu1 %1132 }
 0x48a   : > { %1903 = vpow2.f32 %v1126_v41  ;;  %v1138_v46 = vsel %vm782_vm5, %v1133_v43, 0  ;;  %v1885_v41 = vld [vmem:[%s2553_s12] sm:$0xff]  }
 0x48c   : > { %v1902_v42 = vpop.eup %1901 }
 0x48d   : > { %v1009_v44 = vsel %vm722_vm4, %v1902_v42, 0.0  ;;  %v1012_v45 = vpack.c.bf16 %v1902_v42, %v1902_v42 }
 0x48e   : > { %1010 = vadd.xlane.f32.xlu1 %v1009_v44 }
 0x48f   : > { %1746 = vmatmul.mubr.msk.bf16.vlgmr.msra.gmra.mrb[20].mxu0 %vm722_vm4, %v1012_v45 }
 0x490   : > { %1756 = vmatpush3.bf16.msra.mxu0 %v1138_v46  ;;  %1757 = vmatprep.mubr.msk.bf16.mxu0 %vm2079_vm1, %v2078_v8 }
 0x491   : > { %1769 = vmatprep.subr.bf16.mxu0 %v2078_v8 }
 0x494   : > { %v1904_v47 = vpop.eup %1903 }
 0x495   : > { %v1128_v48 = vsel %vm722_vm4, %v1904_v47, 0.0  ;;  %v1131_v49 = vpack.c.bf16 %v1904_v47, %v1904_v47 }
 0x496   : > { %1129 = vadd.xlane.f32.xlu0 %v1128_v48 }
 0x497   : > { %1758 = vmatmul.mubr.msk.bf16.vlgmr.msra.gmra.mrb[24].mxu0 %vm722_vm4, %v1131_v49 }
 0x498   : > { %1773 = vmatprep.mubr.msk.bf16.mxu0 %vm2079_vm1, %v2078_v8  ;;  %1770 = vmatpush3.bf16.msra.mxu0 %v1883_v40 }
 0x499   : > { %1771 = vmatprep.subr.bf16.mxu0 %v2078_v8 }
 0x49a   : > { %776 = vadd.xlane.f32.xlu0 %v775_v50 }
 0x4e7   : > { %v820_v51 = vpop.f32.mrb[12].mxu0 }
 0x4e8   : > { %v1723_v52 = vpop.f32.mrb[13].mxu0 }
 0x4e9   : > { %v823_v53 = vpop.f32.mrb[14].mxu0 }
 0x4ea   : > { %v1724_v54 = vpop.f32.mrb[15].mxu0  ;;  %v1628_v53 = vld [vmem:[#allocation8] ss:$0 sm:$0xff] }
 0x513   : > { %v891_v55 = vpop.xlane.xlu0 %890 }
 0x51b   : > { %v1011_v61 = vpop.xlane.xlu1 %1010 }
 0x523   : > { %v1130_v56 = vpop.xlane.xlu0 %1129 }
 0x527   : > { %v777_v57 = vpop.xlane.xlu0 %776 }
 0x528   : > { %1905 = vrcp.f32 %v777_v57  ;;  %v1886_v57 = vld [vmem:[%s2553_s12 + $0x8] sm:$0xff]  }
 0x529   : > { %1907 = vrcp.f32 %v891_v55 }
 0x52a   : > { %1909 = vrcp.f32 %v1011_v61  ;;  %v1890_v61 = vld [vmem:[%s2553_s12 + $0x28] sm:$0xff]  }
 0x52b   : > { %1911 = vrcp.f32 %v1130_v56 }
 0x532   : > { %v1906_v58 = vpop.eup %1905 }
 0x533   : > { %v827_v59 = vmul.f32 %v1906_v58, %v820_v51  ;;  %v1908_v62 = vpop.eup %1907  ;;  %v1627_v51 = vld [vmem:[#allocation6] ss:$0 sm:$0xff]  ;;  %v1887_v58 = vld [vmem:[%s2553_s12 + $0x10] sm:$0xff]  }
 0x534   : > { %v1910_v6 = vpop.eup %1909 }
 0x535   : > { %v828_v60 = vpack.c.bf16 %v827_v59, %v827_v59  ;;  %v1912_v16 = vpop.eup %1911  ;;  %v1888_v59 = vld [vmem:[%s2553_s12 + $0x18] sm:$0xff]  }
 0x537   : > { %830 = vst.msk [vmem:[#allocation2] sm:$0xf] %vm829_vm7, %v828_v60  ;;  %v1889_v60 = vld [vmem:[%s2553_s12 + $0x20] sm:$0xff]  }
 0x55a   : > { %v936_v63 = vpop.f32.mrb[16].mxu0 }
 0x55b   : > { %v943_v1 = vmul.f32 %v1908_v62, %v936_v63  ;;  %v1735_v2 = vpop.f32.mrb[17].mxu0  ;;  %v1891_v62 = vld [vmem:[%s2553_s12 + $0x30] sm:$0xff]   ;;  %v1892_v63 = vld [vmem:[%s2553_s12 + $0x38] sm:$0xff]  }
 0x55c   : > { %v939_v3 = vpop.f32.mrb[18].mxu0 }
 0x55d   : > { %v1646_v4 = vpack.c.bf16 %v943_v1, %v943_v1  ;;  %v1736_v5 = vpop.f32.mrb[19].mxu0  ;;  %v1629_v1 = vld [vmem:[%s2552_s11] ss:$0 sm:$0xff] }
 0x55f   : > { %948 = vrot.lane.b32.xlu1 %v1646_v4, %s2083_s29  ;;  %s1599_s29 = sshll.u32 %s494_s15, 3 }
 0x562   : > { %v1055_v7 = vpop.f32.mrb[20].mxu0 }
 0x563   : > { %v1062_v10 = vmul.f32 %v1910_v6, %v1055_v7  ;;  %v1747_v11 = vpop.f32.mrb[21].mxu0 }
 0x564   : > { %v1058_v12 = vpop.f32.mrb[22].mxu0 }
 0x565   : > { %v1647_v14 = vpack.c.bf16 %v1062_v10, %v1062_v10  ;;  %v1748_v15 = vpop.f32.mrb[23].mxu0 }
 0x567   : > { %1067 = vrot.lane.b32.xlu0 %v1647_v14, %s2084_s19  ;;  %s496_s19 = scalar_lea.vmem [#allocation9], %s1599_s29  ;;  %s2009_s29 = scalar_lea.vmem %s2008_s21, 256 }
 0x56a   : > { %v1174_v17 = vpop.f32.mrb[24].mxu0 }
 0x56b   : > { %v1181_v18 = vmul.f32 %v1912_v16, %v1174_v17  ;;  %v1759_v19 = vpop.f32.mrb[25].mxu0  ;;  %v1633_v17 = vld [vmem:[%s2554_s13] ss:$0 sm:$0xff] }
 0x56c   : > { %v1177_v20 = vpop.f32.mrb[26].mxu0 }
 0x56d   : > { %v1648_v21 = vpack.c.bf16 %v1181_v18, %v1181_v18  ;;  %v1760_v22 = vpop.f32.mrb[27].mxu0 }
 0x56f   : > { %1186 = vrot.lane.b32.xlu1 %v1648_v21, %s2085_s20  ;;  %s1499_s20 = sshll.u32 %s496_s19, 4  ;;  %s2500_s20 = int_to_ptr.vmem [resolvable:$true] %s1499_s20 }
 0x570   : > { %s2003_s16 = scalar_lea.vmem %s2500_s20, 128  ;;  %p2010_p4 = scmp.lt.s32.totalorder %s2500_s20, %s2008_s21 }
 0x571   : > { %p2004_p12 = scmp.ne.s32.totalorder %s2500_s20, %s2003_s16  ;;  %p2011_p7 = scmp.lt.s32.totalorder %s2009_s29, %s2003_s16 }
 0x573   : > { %p2005_p2 = pnand %p2004_p12, %p2588_p10  ;;  %p2012_p8 = por %p2011_p7, %p2010_p4 }
 0x575   : > { %p2006_p3 = pneg %p2005_p2 }
 0x577   : > { %p2013_p11 = pnand %p2012_p8, %p2006_p3 }
 0x5d1   : > { %v949_v23 = vpop.permute.xlu1 %948 }
 0x5d2   : > { %952 = vst.msk [vmem:[#allocation2] sm:$0xf] %vm951_vm8, %v949_v23 }
 0x5d9   : > { %v1068_v24 = vpop.permute.xlu0 %1067 }
 0x5da   : > { %1071 = vst.msk [vmem:[#allocation2] sm:$0xf] %vm1070_vm9, %v1068_v24 }
 0x5e1   : > { %v1187_v25 = vpop.permute.xlu1 %1186 }
 0x5e2   : > { %1190 = vst.msk [vmem:[#allocation2] sm:$0xf] %vm1189_vm10, %v1187_v25 }
 0x5e9   : > { %v1191_v26 = vld [vmem:[#allocation2] sm:$0xf] }
 0x5ea   : > { %1766 = vmatmul.mubr.msk.bf16.vlgmr.msra.gmra.mrb[16].mxu1 %vm505_vm0, %v1191_v26 }
 0x5eb   : > { %1793 = vmatprep.mubr.msk.bf16.mxu1 %vm2079_vm1, %v2078_v8  ;;  %1778 = vmatpush3.bf16.msra.mxu1 %v1885_v41 }
 0x5ec   : > { %1779 = vmatprep.subr.bf16.mxu1 %v2078_v8 }
 0x5ef   : > { %1780 = vmatpush3.bf16.msra.mxu1 %v1886_v57 }
 0x5f0   : > { %1781 = vmatprep.subr.bf16.mxu1 %v2078_v8 }
 0x5f3   : > { %1782 = vmatpush3.bf16.msra.mxu1 %v1887_v58 }
 0x5f4   : > { %1783 = vmatprep.subr.bf16.mxu1 %v2078_v8 }
 0x5f7   : > { %1784 = vmatpush3.bf16.msra.mxu1 %v1888_v59 }
 0x5f8   : > { %1785 = vmatprep.subr.bf16.mxu1 %v2078_v8 }
 0x5fb   : > { %1786 = vmatpush3.bf16.msra.mxu1 %v1889_v60 }
 0x5fc   : > { %1787 = vmatprep.subr.bf16.mxu1 %v2078_v8 }
 0x5ff   : > { %1788 = vmatpush3.bf16.msra.mxu1 %v1890_v61 }
 0x600   : > { %1789 = vmatprep.subr.bf16.mxu1 %v2078_v8 }
 0x603   : > { %1790 = vmatpush3.bf16.msra.mxu1 %v1891_v62 }
 0x604   : > { %1791 = vmatprep.subr.bf16.mxu1 %v2078_v8 }
 0x607   : > { %1792 = vmatpush3.bf16.msra.mxu1 %v1892_v63 }
 0x6bd   : > { %v1252_v28 = vpop.f32.mrb[16].mxu1 }
 0x6be   : > { %v1253_v29 = vadd.f32 %v1623_v27, %v1252_v28  ;;  %v1767_v30 = vpop.f32.mrb[17].mxu1 }
 0x6bf   : > { %v1255_v31 = vpop.f32.mrb[18].mxu1 }
 0x6c0   : > { %v2441_v32 = vadd.f32 %v1253_v29, %v2314_v0  ;;  %v1768_v33 = vpop.f32.mrb[19].mxu1  ;;  %v1884_v0 = vld [vmem:[%s2551_s10 + $0x8] sm:$0xff]  }
 0x6c1   : > { %1772 = vmatpush3.bf16.msra.mxu0 %v1884_v0 }
 0x6c2   : > { %v1261_v34 = vsel %vm505_vm0, %v2441_v32, 0.0 }
 0x6c3   : > { %1262 = vadd.xlane.f32.xlu1 %v1261_v34 }
 0x750   : > { %v1263_v35 = vpop.xlane.xlu1 %1262 }
 0x751   : > { %v1264_v36 = vmul.f32 0.03125, %v1263_v35 }
 0x753   : > { %v1265_v37 = vsub.f32 %v2441_v32, %v1264_v36 }
 0x755   : > { %v1266_v38 = vmul.f32 %v1265_v37, %v1265_v37 }
 0x757   : > { %v1267_v39 = vsel %vm505_vm0, %v1266_v38, 0.0 }
 0x758   : > { %1268 = vadd.xlane.f32.xlu0 %v1267_v39 }
 0x7e5   : > { %v1269_v42 = vpop.xlane.xlu0 %1268 }
 0x7e6   : > { %v1270_v43 = vmul.f32 0.03125, %v1269_v42 }
 0x7e8   : > { %v1271_v44 = vadd.f32 1e-05, %v1270_v43 }
 0x7ea   : > { %1913 = vrsqrt.f32 %v1271_v44  ;;  %vm1274_vm11 = vcmp.eq.f32.partialorder %v1271_v44, inf  ;;  %v1277_v47 = vand.u32 2147483648, %v1271_v44  ;;  %vm1276_vm12 = vcmp.eq.f32.partialorder %v1271_v44, 0.0 }
 0x7f4   : > { %v1914_v45 = vpop.eup %1913 }
 0x7f5   : > { %v1273_v46 = vmul.f32 %v1914_v45, %v1271_v44 }
 0x7f7   : > { %v1275_v48 = vsel %vm1274_vm11, %v1271_v44, %v1273_v46 }
 0x7f8   : > { %v1278_v49 = vsel %vm1276_vm12, %v1277_v47, %v1275_v48 }
 0x7f9   : > { %1915 = vrcp.f32 %v1278_v49 }
 0x803   : > { %v1916_v50 = vpop.eup %1915 }
 0x804   : > { %v1280_v52 = vmul.f32 %v1916_v50, %v1265_v37 }
 0x806   : > { %v1287_v54 = vmul.f32 %v1627_v51, %v1280_v52 }
 0x808   : > { %v1294_v55 = vadd.f32 %v1628_v53, %v1287_v54 }
 0x80a   : > { %v1295_v56 = vpack.c.bf16 %v1294_v55, %v1294_v55 }
 0x80c   : > { %1774 = vmatmul.mubr.msk.bf16.vlgmr.msra.gmra.mrb[28].mxu0 %vm505_vm0, %v1295_v56 }
 0x8df   : > { %v1356_v2 = vpop.f32.mrb[28].mxu0 }
 0x8e0   : > { %v1357_v3 = vadd.f32 %v1629_v1, %v1356_v2  ;;  %v1775_v4 = vpop.f32.mrb[29].mxu0 }
 0x8e1   : > { %v1359_v5 = vpop.f32.mrb[30].mxu0 }
 0x8e2   : > { %v1363_v6 = vmul.f32 0.044715, %v1357_v3  ;;  %v1776_v7 = vpop.f32.mrb[31].mxu0  ;;  %v1362_v8 = vmul.f32 0.5, %v1357_v3 }
 0x8e4   : > { %v1364_v9 = vmul.f32 %v1363_v6, %v1357_v3 }
 0x8e6   : > { %v1365_v10 = vmul.f32 %v1364_v9, %v1357_v3 }
 0x8e8   : > { %v1366_v11 = vadd.f32 %v1365_v10, %v1357_v3 }
 0x8ea   : > { %v1367_v12 = vmul.f32 0.7978846, %v1366_v11 }
 0x8ec   : > { %1917 = vtanh.f32 %v1367_v12 }
 0x8f6   : > { %v1918_v13 = vpop.eup %1917 }
 0x8f7   : > { %v1369_v14 = vadd.f32 1.0, %v1918_v13 }
 0x8f9   : > { %v1370_v15 = vmul.f32 %v1369_v14, %v1362_v8 }
 0x8fb   : > { %v1371_v16 = vpack.c.bf16 %v1370_v15, %v1370_v15 }
 0x8fd   : > { %1794 = vmatmul.mubr.bf16.vlgmr.msra.gmra.mrb[20].mxu1 %v1371_v16 }
 0x9d0   : > { %v1477_v18 = vpop.f32.mrb[20].mxu1 }
 0x9d1   : > { %v1478_v19 = vadd.f32 %v1633_v17, %v1477_v18  ;;  %v1795_v20 = vpop.f32.mrb[21].mxu1 }
 0x9d2   : > { %v1480_v21 = vpop.f32.mrb[22].mxu1 }
 0x9d3   : > { %v1483_v22 = vadd.f32 %v1478_v19, %v2441_v32  ;;  %v1796_v23 = vpop.f32.mrb[23].mxu1 }
 0x9d5   : > { %1484 = vst.msk [vmem:[%s496_s19] sm:$0xff] %vm505_vm0, %v1483_v22 }
 0x9d6   : > { %2016 = shalt.err (!%p2013_p11)
}
 0x9d7   : > { %s2017_s15 = scalar_lea.hbm %s2498_s24, 128  ;;  %s2021_s23 = scalar_lea.hbm %s2587_s25, 256 }
 0x9d8   : > { %p2018_p13 = scmp.ne.s32.totalorder %s2498_s24, %s2017_s15  ;;  %p2022_p6 = scmp.lt.u32.totalorder %s2498_s24, %s2587_s25 }
 0x9d9   : > { %p2023_p5 = scmp.lt.u32.totalorder %s2021_s23, %s2017_s15  ;;  %p2025_p12 = scmp.lt.u32.totalorder %s2017_s15, %s2498_s24 }
 0x9da   : > { %p2019_p0 = pnand %p2018_p13, %p2588_p10 }
 0x9db   : > { %p2024_p9 = por %p2023_p5, %p2022_p6 }
 0x9dc   : > { %p2020_p1 = pneg %p2019_p0 }
 0x9dd   : > { %p2026_p2 = por %p2025_p12, %p2024_p9 }
 0x9df   : > { %p2027_p3 = pnand %p2026_p2, %p2020_p1 }
 0x9e1   : > { %2030 = shalt.err (!%p2027_p3)
}
 0x9e2   : > { %1809 = dma.vmem_to_hbm [thread:$0]  (%p2588_p10), %s2500_s20, 128, %s2498_s24, %s1486_s17  }
 0x9e3 PF: > { %s2589_s28 = sld [smem:[#allocation15_spill]]  ;;  %s2590_s16 = sld [smem:[#allocation13_spill]] }
 0x9e4   : > { %s2591_s26 = sld [smem:[#allocation19_spill]] }
 0x9e9   : > { %p1831_p4 = scmp.ge.s32.totalorder %s2589_s28, 2  ;;  %s1511_s21 = sand.u32 1, %s2590_s16  }
 0x9ea   : > { %p2592_p7 = scmp.ne.s32.totalorder %s2591_s26, 0  ;;  %s1512_s29 = scalar_lea.sflag [#allocation5], %s1511_s21 }
 0x9ec   : > { %p1822_p8 = pnand %p1831_p4, %p2592_p7 }
 0x9ee   : > { %2056 = dma.done.wait (!%p1822_p8), %s1512_s29, 128  }
 0x9ef   : > { %2058 = vsyncadd (!%p1822_p8), %s1512_s29, 4294967168  ;;  %s2593_s16 = sld [smem:[#allocation16_spill]]  ;;  %s2594_s15 = sld [smem:[#allocation14_spill]] }
 0x9f0   : > { %s2595_s27 = sld [smem:[#allocation17_spill]]  ;;  %s2596_s29 = smov %s2065_s30 }
 0x9f5   : > { %p26_p11 = scmp.ge.s32.totalorder %s2593_s16, 4   ;;  %s2597_s30 = smov %s2594_s15 }
 0x9f6   : > { %s2598_s15 = smov %s2595_s27 }
 0x9f7   :  { %28 = sbr.rel (!%p26_p11) target bundleno = 7 (0x7), region = 124 }
 0x9fe   :  { %1517 = vsyncpa [#allocation4], 1 }
 0x9ff   :  { %1519 = vsyncpa [#allocation4 + $0x1], 1 }
 0xa00   :  { %1520 = vsyncpa [#allocation7], 1 }
 0xa01   :  { %1521 = vsyncpa [#allocation5], 1 }
 0xa02   :  { %1523 = vsyncpa [#allocation5 + $0x1], 1 }

// kernel: tpu_custom_call.1
= control target key start
LH: loop header
LB: loop body
LE: loop exit
PB: predicated region body
PF: predicated region fallthrough
CT: control target
= control target key end

     0   :  { %s2541_s0 = inlined_call_operand.vmem [shape: f32[2,8,32], index: 0, kind: input, shape index: {}]   ;;  %s2542_s1 = inlined_call_operand.vmem [shape: f32[1,32], index: 1, kind: input, shape index: {}]   ;;  %s2543_s2 = inlined_call_operand.vmem [shape: f32[1,32], index: 2, kind: input, shape index: {}]   ;;  %s2544_s3 = inlined_call_operand.vmem [shape: bf16[32,32], index: 3, kind: input, shape index: {}]   ;;  %s2545_s4 = inlined_call_operand.vmem [shape: bf16[32,32], index: 4, kind: input, shape index: {}]   ;;  %s2546_s5 = inlined_call_operand.vmem [shape: bf16[32,32], index: 5, kind: input, shape index: {}]   ;;  %s2547_s6 = inlined_call_operand.vmem [shape: bf16[32,32], index: 6, kind: input, shape index: {}]   ;;  %s2548_s7 = inlined_call_operand.hbm [shape: f32[1,32], index: 7, kind: input, shape index: {}]   ;;  %s2549_s8 = inlined_call_operand.hbm [shape: f32[1,32], index: 8, kind: input, shape index: {}]   ;;  %s2550_s9 = inlined_call_operand.hbm [shape: f32[1,32], index: 9, kind: input, shape index: {}]   ;;  %s2551_s10 = inlined_call_operand.vmem [shape: bf16[32,128], index: 10, kind: input, shape index: {}]   ;;  %s2552_s11 = inlined_call_operand.vmem [shape: f32[1,128], index: 11, kind: input, shape index: {}]   ;;  %s2553_s12 = inlined_call_operand.vmem [shape: bf16[128,32], index: 12, kind: input, shape index: {}]   ;;  %s2554_s13 = inlined_call_operand.vmem [shape: f32[1,32], index: 13, kind: input, shape index: {}]   ;;  %s2555_s14 = inlined_call_operand.hbm [shape: f32[2,8,32], index: 14, kind: output, shape index: {}]  }
   0x1   :  { %2568 = sst [smem:[#allocation20_spill]] %s2555_s14 }
   0x2   :  { %19 = vsyncpa [#allocation4], 0 }
   0x3   :  { %20 = vsyncpa [#allocation7], 0 }
   0x4   :  { %21 = vsyncpa [#allocation5], 0 }
   0x5   :  { %23 = vsyncpa [#allocation5 + $0x1], 0  ;;  %s2162_s29 = smov 0   ;;  %s2164_s30 = smov 0  }
   0x6   :  { %s2166_s15 = smov 0   ;;  %s2168_s16 = smov 0  }
   0x7 LB: > { %2569 = sst [smem:[#allocation13_spill]] %s2061_s29  ;;  %s2183_s17 = sadd.s32 4294967295, %s2073_s16   ;;  %s2073_s16 = sphi %s2168_s16, %s2593_s16   ;;  %s2069_s15 = sphi %s2166_s15, %s2598_s15   ;;  %s2065_s30 = sphi %s2164_s30, %s2597_s30   ;;  %s2061_s29 = sphi %s2162_s29, %s2596_s29  }
   0x8   : > { %2570 = sst [smem:[#allocation14_spill]] %s2069_s15  ;;  %s1589_s18 = sadd.s32 4294967294, %s2073_s16  }
   0x9   : > { %2571 = sst [smem:[#allocation15_spill]] %s2073_s16  ;;  %s2187_s19 = sadd.s32 1, %s2073_s16  }
   0xa   : > { %2572 = sst [smem:[#allocation16_spill]] %s2187_s19  ;;  %s335_s20 = sadd.s32 1, %s2069_s15 }
   0xb   : > { %s332_s21 = ssub.s32 %s2073_s16, %s2187_s19  ;;  %p345_p0 = scmp.ne.s32.totalorder %s2069_s15, %s2065_s30 }
   0xc   : > { %p333_p1 = scmp.eq.s32.totalorder %s332_s21, 0  ;;  %p346_p2 = scmp.eq.s32.totalorder %s2183_s17, 1 }
   0xd   : > { %p351_p3 = scmp.ne.s32.totalorder %s2065_s30, %s2061_s29  ;;  %p352_p4 = scmp.eq.s32.totalorder %s1589_s18, 1 }
   0xe   : > { %s2198_s22 = scalar_select %p333_p1, %s2069_s15, %s335_s20  }
   0xf   : > { %p2200_p5 = por %p346_p2, %p345_p0  ;;  %p2204_p6 = por %p352_p4, %p351_p3 }
  0x10   : > { %2573 = sst [smem:[#allocation17_spill]] %s2198_s22  ;;  %p1590_p7 = scmp.ge.s32.totalorder %s2073_s16, 1 }
  0x11   : > { %s2574_s23 = scalar_select %p2200_p5, 1, 0 }
  0x12   : > { %s2576_s24 = scalar_select %p2204_p6, 1, 0 }
  0x13   : > { %2575 = sst [smem:[#allocation18_spill]] %s2574_s23  ;;  %p359_p8 = scmp.lt.s32.totalorder %s2073_s16, 3 }
  0x14   : > { %2577 = sst [smem:[#allocation19_spill]] %s2576_s24  ;;  %p2562_p9 = scmp.eq.s32.totalorder %s2183_s17, 0 }
  0x15   : > { %p2211_p10 = pnand %p1590_p7, %p359_p8  ;;  %s2075_s26 = smov [#allocation6]  }
  0x16   : > { %s401_s27 = sshll.u32 %s2075_s26, 4  ;;  %s2076_s28 = smov [#allocation3]   ;;  %s402_s27 = int_to_ptr.vmem [resolvable:$true] %s401_s27 }
  0x17   : > { %s2578_s25 = scalar_select %p2211_p10, 1, 0 }
  0x18   : > { %p1811_p11 = pneg %p2211_p10  ;;  %s390_s18 = sshll.u32 %s2076_s28, 4  ;;  %s2223_s18 = int_to_ptr.vmem [resolvable:$true] %s390_s18 }
  0x19   : > { %s2077_s21 = smov [#allocation8]   ;;  %s1919_s26 = scalar_lea.hbm %s2549_s8, 16 }
  0x1a   : > { %p2219_p12 = pnand %p2562_p9, %p1811_p11  ;;  %s412_s22 = sshll.u32 %s2077_s21, 4  ;;  %s2225_s22 = int_to_ptr.vmem [resolvable:$true] %s412_s22 }
  0x1b   : > { %p1920_p13 = scmp.ne.s32.totalorder %s2549_s8, %s1919_s26  ;;  %p1926_p3 = scmp.lt.u32.totalorder %s1919_s26, %s2549_s8 }
  0x1c   : > { %p2235_p0 = pneg %p2219_p12 }
  0x1e   : > { %p1922_p1 = pnand %p2235_p0, %p1920_p13 }
  0x20   : > { %p1923_p2 = pneg %p1922_p1 }
  0x22   : > { %p1928_p4 = pnand %p1926_p3, %p1923_p2 }
  0x24   : > { %1931 = shalt.err (!%p1928_p4)
}
  0x25   : > { %s1932_s15 = scalar_lea.vmem %s402_s27, 16  ;;  %s1939_s29 = scalar_lea.vmem %s402_s27, 32 }
  0x26   : > { %p1933_p7 = scmp.ne.s32.totalorder %s402_s27, %s1932_s15  ;;  %p1940_p9 = scmp.lt.s32.totalorder %s402_s27, %s402_s27 }
  0x27   : > { %p1941_p6 = scmp.lt.s32.totalorder %s1939_s29, %s1932_s15 }
  0x28   : > { %p1935_p8 = pnand %p1933_p7, %p2235_p0 }
  0x29   : > { %p1942_p5 = por %p1941_p6, %p1940_p9 }
  0x2a   : > { %p1936_p11 = pneg %p1935_p8 }
  0x2c   : > { %p1943_p10 = pnand %p1942_p5, %p1936_p11 }
  0x2e   : > { %1946 = shalt.err (!%p1943_p10)
}
  0x2f   : > { %1817 = dma.hbm_to_vmem [thread:$0]  (!%p2219_p12), %s2549_s8, 16, %s402_s27, [#allocation7]  }
  0x30   : > { %s1947_s21 = scalar_lea.hbm %s2548_s7, 16 }
  0x31   : > { %p1948_p13 = scmp.ne.s32.totalorder %s2548_s7, %s1947_s21  ;;  %p1954_p5 = scmp.lt.u32.totalorder %s1947_s21, %s2548_s7 }
  0x33   : > { %p1950_p1 = pnand %p1948_p13, %p2235_p0 }
  0x35   : > { %p1951_p6 = pneg %p1950_p1 }
  0x37   : > { %p1956_p9 = pnand %p1954_p5, %p1951_p6 }
  0x39   : > { %1959 = shalt.err (!%p1956_p9)
}
  0x3a   : > { %s1960_s27 = scalar_lea.vmem %s2223_s18, 16  ;;  %s1967_s14 = scalar_lea.vmem %s2223_s18, 32 }
  0x3b   : > { %p1961_p10 = scmp.ne.s32.totalorder %s2223_s18, %s1960_s27  ;;  %p1968_p4 = scmp.lt.s32.totalorder %s2223_s18, %s2223_s18 }
  0x3c   : > { %p1969_p7 = scmp.lt.s32.totalorder %s1967_s14, %s1960_s27 }
  0x3d   : > { %p1963_p2 = pnand %p1961_p10, %p2235_p0 }
  0x3e   : > { %p1970_p8 = por %p1969_p7, %p1968_p4 }
  0x3f   : > { %p1964_p3 = pneg %p1963_p2 }
  0x41   : > { %p1971_p11 = pnand %p1970_p8, %p1964_p3 }
  0x43   : > { %1974 = shalt.err (!%p1971_p11)
}
  0x44   : > { %1814 = dma.hbm_to_vmem [thread:$0]  (!%p2219_p12), %s2548_s7, 16, %s2223_s18, [#allocation4]  }
  0x45   : > { %s1975_s26 = scalar_lea.hbm %s2550_s9, 16 }
  0x46   : > { %p1976_p13 = scmp.ne.s32.totalorder %s2550_s9, %s1975_s26  ;;  %p1982_p5 = scmp.lt.u32.totalorder %s1975_s26, %s2550_s9 }
  0x48   : > { %p1978_p1 = pnand %p1976_p13, %p2235_p0 }
  0x4a   : > { %p1979_p6 = pneg %p1978_p1 }
  0x4c   : > { %p1984_p9 = pnand %p1982_p5, %p1979_p6 }
  0x4e   : > { %1987 = shalt.err (!%p1984_p9)
}
  0x4f   : > { %s1988_s18 = scalar_lea.vmem %s2225_s22, 16  ;;  %s1995_s14 = scalar_lea.vmem %s2225_s22, 32 }
  0x50   : > { %p1989_p10 = scmp.ne.s32.totalorder %s2225_s22, %s1988_s18  ;;  %p1996_p4 = scmp.lt.s32.totalorder %s2225_s22, %s2225_s22 }
  0x51   : > { %p1997_p7 = scmp.lt.s32.totalorder %s1995_s14, %s1988_s18 }
  0x52   : > { %p1991_p2 = pnand %p1989_p10, %p2235_p0 }
  0x53   : > { %p1998_p8 = por %p1997_p7, %p1996_p4 }
  0x54   : > { %p1992_p3 = pneg %p1991_p2 }
  0x56   : > { %p1999_p11 = pnand %p1998_p8, %p1992_p3 }
  0x58   : > { %2002 = shalt.err (!%p1999_p11)
}
  0x59   : > { %1820 = dma.hbm_to_vmem [thread:$0]  (!%p2219_p12), %s2550_s9, 16, %s2225_s22, [#allocation7]  }
  0x5a   : > { %p2581_p13 = scmp.ne.s32.totalorder %s2578_s25, 0 }
  0x5b   : > { %p2582_p0 = scmp.eq.s32.totalorder (!%p2581_p13), %s2183_s17, 0 }
  0x5c   : > { %444 = sbr.rel (%p2581_p13) target bundleno = 2531 (0x9e3), region = 76 }
  0x63   : > { %2048 = dma.done.wait (%p2582_p0), [#allocation4], 16   ;;  %p2583_p1 = pmov %p2582_p0 }
  0x64   : > { %p2584_p6 = pmov %p2582_p0 }
  0x65   : > { %2050 = vsyncadd (%p2583_p1), [#allocation4], 4294967280 }
  0x66   : > { %2052 = dma.done.wait (%p2584_p6), [#allocation7], 32   ;;  %p2585_p5 = pmov %p2582_p0 }
  0x67   : > { %p497_p9 = scmp.lt.s32.totalorder %s2183_s17, 1  ;;  %vm505_vm0 = vcmask 261120   ;;  %v1875_v7 = vld [vmem:[%s2544_s3] sm:$0xff]   ;;  %v2078_v8 = vmov 0.0   ;;  %vm2079_vm1 = vmmov 0   ;;  %v1876_v9 = vld [vmem:[%s2544_s3 + $0x8] sm:$0xff]   ;;  %v716_v55 = vlaneseq }
  0x68   : > { %2054 = vsyncadd (%p2585_p5), [#allocation7], 4294967264  ;;  %1689 = vmatprep.subr.bf16.mxu0 %v2078_v8  ;;  %1693 = vmatprep.mubr.msk.bf16.mxu0 %vm2079_vm1, %v2078_v8  ;;  %v1601_v19 = vld [vmem:[%s2542_s1] ss:$0 sm:$0xff]  ;;  %v1878_v26 = vld [vmem:[%s2545_s4 + $0x8] sm:$0xff]   ;;  %vm722_vm4 = vcmask 64512  }
  0x69   : > { %s498_s20 = scalar_select %p497_p9, %s2183_s17, 1  ;;  %1690 = vmatpush3.bf16.msra.mxu0 %v1875_v7  ;;  %1713 = vmatprep.subr.bf16.mxu1 %v2078_v8  ;;  %v1602_v21 = vld [vmem:[%s2543_s2] ss:$0 sm:$0xff]  ;;  %v1880_v28 = vld [vmem:[%s2546_s5 + $0x8] sm:$0xff]   ;;  %vm782_vm5 = vcmask 1043456   ;;  %v717_v56 = vshrl.u32 %v716_v55, 7 }
  0x6a   : > { %1691 = vmatprep.subr.bf16.mxu0 %v2078_v8  ;;  %1715 = vmatprep.mubr.msk.bf16.mxu1 %vm2079_vm1, %v2078_v8  ;;  %v1877_v24 = vld [vmem:[%s2545_s4] sm:$0xff]   ;;  %s2080_s26 = smov 112   ;;  %s2081_s21 = smov 120   ;;  %v719_v57 = vand.u32 127, %v716_v55  ;;  %vm829_vm7 = vcmask 60416   ;;  %vm951_vm8 = vcmask 126016  }
  0x6b   : > { %s1600_s22 = sshll.u32 %s498_s20, 3  ;;  %v1879_v27 = vld [vmem:[%s2546_s5] sm:$0xff]   ;;  %s2082_s15 = smov 104   ;;  %vm1070_vm9 = vcmask 191616   ;;  %vm1189_vm10 = vcmask 257216  }
  0x6c   : > { %s500_s24 = scalar_lea.vmem %s2541_s0, %s1600_s22  ;;  %vm720_vm6 = vcmp.gt.s32.totalorder %v719_v57, %v717_v56  ;;  %s2083_s29 = smov 8  }
  0x6d   : > { %v2314_v0 = vld [vmem:[%s500_s24] sm:$0xff]  ;;  %1692 = vmatpush3.bf16.msra.mxu0 %v1876_v9  ;;  %v721_v58 = vsel %vm720_vm6, -1e+30, %v2078_v8  ;;  %s2084_s19 = smov 16   ;;  %s2085_s20 = smov 24  }
  0x6e   : > { %v506_v1 = vsel %vm505_vm0, %v2314_v0, 0.0  ;;  %1697 = vmatprep.subr.bf16.mxu0 %v2078_v8  ;;  %s2586_s14 = sld [smem:[#allocation18_spill]]  ;;  %s1643_s23 = sshll.u32 %s2183_s17, 7 }
  0x6f   : > { %507 = vadd.xlane.f32.xlu0 %v506_v1  ;;  %s2587_s25 = sld [smem:[#allocation20_spill]] }
  0x74   : > { %p2588_p10 = scmp.ne.s32.totalorder %s2586_s14, 0 }
  0x75   : > { %s2498_s24 = scalar_lea.hbm %s2587_s25, %s1643_s23 }
  0xfc   : > { %v508_v2 = vpop.xlane.xlu0 %507 }
  0xfd   : > { %v510_v3 = vmul.f32 0.03125, %v508_v2 }
  0xff   : > { %v511_v4 = vsub.f32 %v2314_v0, %v510_v3 }
 0x101   : > { %v512_v5 = vmul.f32 %v511_v4, %v511_v4 }
 0x103   : > { %v513_v6 = vsel %vm505_vm0, %v512_v5, 0.0 }
 0x104   : > { %514 = vadd.xlane.f32.xlu0 %v513_v6 }
 0x191   : > { %v515_v10 = vpop.xlane.xlu0 %514 }
 0x192   : > { %v516_v11 = vmul.f32 0.03125, %v515_v10 }
 0x194   : > { %v517_v12 = vadd.f32 1e-05, %v516_v11 }
 0x196   : > { %1893 = vrsqrt.f32 %v517_v12  ;;  %vm520_vm2 = vcmp.eq.f32.partialorder %v517_v12, inf  ;;  %v523_v15 = vand.u32 2147483648, %v517_v12  ;;  %vm522_vm3 = vcmp.eq.f32.partialorder %v517_v12, 0.0 }
 0x1a0   : > { %v1894_v13 = vpop.eup %1893 }
 0x1a1   : > { %v519_v14 = vmul.f32 %v1894_v13, %v517_v12 }
 0x1a3   : > { %v521_v16 = vsel %vm520_vm2, %v517_v12, %v519_v14 }
 0x1a4   : > { %v524_v17 = vsel %vm522_vm3, %v523_v15, %v521_v16 }
 0x1a5   : > { %1895 = vrcp.f32 %v524_v17 }
 0x1af   : > { %v1896_v18 = vpop.eup %1895 }
 0x1b0   : > { %v526_v20 = vmul.f32 %v1896_v18, %v511_v4 }
 0x1b2   : > { %v533_v22 = vmul.f32 %v1601_v19, %v526_v20 }
 0x1b4   : > { %v540_v23 = vadd.f32 %v1602_v21, %v533_v22 }
 0x1b6   : > { %v541_v25 = vpack.c.bf16 %v540_v23, %v540_v23 }
 0x1b8   : > { %1694 = vmatmul.mubr.msk.bf16.vlgmr.msra.gmra.mrb[0].mxu0 %vm505_vm0, %v541_v25 }
 0x1b9   : > { %1698 = vmatpush3.bf16.msra.mxu0 %v1877_v24  ;;  %1701 = vmatprep.mubr.msk.bf16.mxu0 %vm2079_vm1, %v2078_v8 }
 0x1ba   : > { %1699 = vmatprep.subr.bf16.mxu0 %v2078_v8 }
 0x1bd   : > { %1700 = vmatpush3.bf16.msra.mxu0 %v1878_v26 }
 0x1be   : > { %1705 = vmatprep.subr.bf16.mxu0 %v2078_v8 }
 0x1c0   : > { %1702 = vmatmul.mubr.msk.bf16.vlgmr.msra.gmra.mrb[4].mxu0 %vm505_vm0, %v541_v25 }
 0x1c1   : > { %1706 = vmatpush3.bf16.msra.mxu0 %v1879_v27  ;;  %1709 = vmatprep.mubr.msk.bf16.mxu0 %vm2079_vm1, %v2078_v8 }
 0x1c2   : > { %1707 = vmatprep.subr.bf16.mxu0 %v2078_v8 }
 0x1c5   : > { %1708 = vmatpush3.bf16.msra.mxu0 %v1880_v28 }
 0x1c6   : > { %1719 = vmatprep.subr.bf16.mxu0 %v2078_v8 }
 0x1c8   : > { %1710 = vmatmul.mubr.msk.bf16.vlgmr.msra.gmra.mrb[8].mxu0 %vm505_vm0, %v541_v25 }
 0x1c9   : > { %1721 = vmatprep.mubr.msk.bf16.mxu0 %vm2079_vm1, %v2078_v8 }
 0x28b   : > { %v595_v29 = vpop.f32.mrb[0].mxu0 }
 0x28c   : > { %v1695_v30 = vpop.f32.mrb[1].mxu0  ;;  %v601_v39 = vpack.c.bf16 %v595_v29, %v595_v29 }
 0x28d   : > { %v598_v31 = vpop.f32.mrb[2].mxu0 }
 0x28e   : > { %v1696_v32 = vpop.f32.mrb[3].mxu0 }
 0x293   : > { %v652_v33 = vpop.f32.mrb[4].mxu0 }
 0x294   : > { %v658_v34 = vpack.c.bf16 %v652_v33, %v652_v33  ;;  %v1703_v35 = vpop.f32.mrb[5].mxu0 }
 0x295   : > { %v655_v36 = vpop.f32.mrb[6].mxu0 }
 0x296   : > { %955 = vrot.lane.b32.xlu0 %v658_v34, %s2080_s26  ;;  %835 = vrot.lane.b32.xlu1 %v658_v34, %s2081_s21  ;;  %v1704_v37 = vpop.f32.mrb[7].mxu0  ;;  %v727_v38 = vsel %vm722_vm4, %v658_v34, 0 }
 0x297   : > { %1714 = vmatpush3.bf16.xpose.msra.mxu1 %v727_v38 }
 0x298   : > { %1725 = vmatprep.subr.bf16.mxu1 %v2078_v8 }
 0x29a   : > { %832 = vrot.lane.b32.xlu1 %v601_v39, %s2081_s21 }
 0x29b   : > { %v709_v40 = vpop.f32.mrb[8].mxu0 }
 0x29c   : > { %v2370_v41 = vpack.c.bf16 %v709_v40, %v709_v40  ;;  %v1711_v42 = vpop.f32.mrb[9].mxu0 }
 0x29d   : > { %v712_v43 = vpop.f32.mrb[10].mxu0 }
 0x29e   : > { %953 = vrot.lane.b32.xlu1 %v601_v39, %s2080_s26  ;;  %v1712_v44 = vpop.f32.mrb[11].mxu0  ;;  %1716 = vmatmul.mubr.msk.bf16.vlgmr.msra.gmra.mrb[0].mxu1 %vm722_vm4, %v601_v39  ;;  %v784_v45 = vsel %vm782_vm5, %v2370_v41, 0 }
 0x29f   : > { %1720 = vmatpush3.bf16.msra.mxu0 %v784_v45  ;;  %1727 = vmatprep.mubr.msk.bf16.mxu1 %vm2079_vm1, %v2078_v8 }
 0x2a0   : > { %1731 = vmatprep.subr.bf16.mxu0 %v2078_v8 }
 0x2a2   : > { %1074 = vrot.lane.b32.xlu1 %v658_v34, %s2082_s15 }
 0x2a6   : > { %1072 = vrot.lane.b32.xlu1 %v601_v39, %s2082_s15 }
 0x308   : > { %v836_v46 = vpop.permute.xlu1 %835  ;;  %v956_v49 = vpop.permute.xlu0 %955 }
 0x309   : > { %v841_v47 = vsel %vm722_vm4, %v836_v46, 0  ;;  %v961_v51 = vsel %vm722_vm4, %v956_v49, 0 }
 0x30a   : > { %1726 = vmatpush3.bf16.xpose.msra.mxu1 %v841_v47 }
 0x30b   : > { %1737 = vmatprep.subr.bf16.mxu1 %v2078_v8 }
 0x30c   : > { %v833_v48 = vpop.permute.xlu1 %832 }
 0x310   : > { %v954_v50 = vpop.permute.xlu1 %953 }
 0x311   : > { %1728 = vmatmul.mubr.msk.bf16.vlgmr.msra.gmra.mrb[4].mxu1 %vm722_vm4, %v833_v48 }
 0x312   : > { %1738 = vmatpush3.bf16.xpose.msra.mxu1 %v961_v51  ;;  %1739 = vmatprep.mubr.msk.bf16.mxu1 %vm2079_vm1, %v2078_v8 }
 0x313   : > { %1749 = vmatprep.subr.bf16.mxu1 %v2078_v8 }
 0x314   : > { %v1075_v52 = vpop.permute.xlu1 %1074 }
 0x315   : > { %v1080_v53 = vsel %vm722_vm4, %v1075_v52, 0 }
 0x318   : > { %v1073_v54 = vpop.permute.xlu1 %1072 }
 0x319   : > { %1740 = vmatmul.mubr.msk.bf16.vlgmr.msra.gmra.mrb[8].mxu1 %vm722_vm4, %v954_v50 }
 0x31a   : > { %1750 = vmatpush3.bf16.xpose.msra.mxu1 %v1080_v53  ;;  %1751 = vmatprep.mubr.msk.bf16.mxu1 %vm2079_vm1, %v2078_v8 }
 0x31b   : > { %1761 = vmatprep.subr.bf16.mxu1 %v2078_v8 }
 0x321   : > { %1752 = vmatmul.mubr.msk.bf16.vlgmr.msra.gmra.mrb[12].mxu1 %vm722_vm4, %v1073_v54 }
 0x322   : > { %1765 = vmatprep.mubr.msk.bf16.mxu1 %vm2079_vm1, %v2078_v8 }
 0x371   : > { %v763_v59 = vpop.f32.mrb[0].mxu1 }
 0x372   : > { %v764_v60 = vadd.f32 %v763_v59, %v721_v58  ;;  %v1717_v61 = vpop.f32.mrb[1].mxu1 }
 0x373   : > { %v766_v62 = vpop.f32.mrb[2].mxu1 }
 0x374   : > { %v1718_v63 = vpop.f32.mrb[3].mxu1  ;;  %v769_v1 = vsel %vm722_vm4, %v764_v60, -inf }
 0x375   : > { %770 = vmax.xlane.f32.xlu1 %v769_v1 }
 0x386   : > { %1013 = vrot.lane.b32.xlu1 %v2370_v41, %s2080_s26  ;;  %s2086_s26 = smov [#allocation9]  }
 0x3e4   : > { %v877_v2 = vpop.f32.mrb[4].mxu1 }
 0x3e5   : > { %v878_v3 = vadd.f32 %v877_v2, %v721_v58  ;;  %v1729_v4 = vpop.f32.mrb[5].mxu1 }
 0x3e6   : > { %v880_v5 = vpop.f32.mrb[6].mxu1 }
 0x3e7   : > { %v1730_v6 = vpop.f32.mrb[7].mxu1  ;;  %v883_v7 = vsel %vm722_vm4, %v878_v3, -inf }
 0x3e8   : > { %884 = vmax.xlane.f32.xlu0 %v883_v7 }
 0x3ec   : > { %v997_v9 = vpop.f32.mrb[8].mxu1 }
 0x3ed   : > { %v998_v10 = vadd.f32 %v997_v9, %v721_v58  ;;  %v1741_v11 = vpop.f32.mrb[9].mxu1  ;;  %v1881_v9 = vld [vmem:[%s2547_s6] sm:$0xff]  }
 0x3ee   : > { %v1000_v12 = vpop.f32.mrb[10].mxu1  ;;  %1762 = vmatpush3.bf16.msra.mxu1 %v1881_v9 }
 0x3ef   : > { %v1742_v13 = vpop.f32.mrb[11].mxu1  ;;  %v1003_v14 = vsel %vm722_vm4, %v998_v10, -inf  ;;  %1763 = vmatprep.subr.bf16.mxu1 %v2078_v8 }
 0x3f0   : > { %1004 = vmax.xlane.f32.xlu1 %v1003_v14  ;;  %v1882_v13 = vld [vmem:[%s2547_s6 + $0x8] sm:$0xff]  }
 0x3f2   : > { %1764 = vmatpush3.bf16.msra.mxu1 %v1882_v13 }
 0x3f3   : > { %1777 = vmatprep.subr.bf16.mxu1 %v2078_v8 }
 0x3f4   : > { %v1116_v15 = vpop.f32.mrb[12].mxu1 }
 0x3f5   : > { %v1117_v16 = vadd.f32 %v1116_v15, %v721_v58  ;;  %v1753_v17 = vpop.f32.mrb[13].mxu1 }
 0x3f6   : > { %v1119_v18 = vpop.f32.mrb[14].mxu1 }
 0x3f7   : > { %v1754_v19 = vpop.f32.mrb[15].mxu1  ;;  %v1122_v20 = vsel %vm722_vm4, %v1117_v16, -inf }
 0x3f8   : > { %1123 = vmax.xlane.f32.xlu1 %v1122_v20 }
 0x3fe   : > { %894 = vrot.lane.b32.xlu0 %v2370_v41, %s2081_s21  ;;  %s2007_s21 = sshll.u32 %s2086_s26, 4  ;;  %s2008_s21 = int_to_ptr.vmem [resolvable:$false] %s2007_s21 }
 0x402   : > { %v771_v21 = vpop.xlane.xlu1 %770 }
 0x403   : > { %v772_v22 = vsub.f32 %v764_v60, %v771_v21 }
 0x405   : > { %v773_v23 = vmul.f32 1.442695, %v772_v22 }
 0x406   : > { %v1014_v29 = vpop.permute.xlu1 %1013 }
 0x407   : > { %1897 = vpow2.f32 %v773_v23  ;;  %v1019_v40 = vsel %vm782_vm5, %v1014_v29, 0 }
 0x409   : > { %1132 = vrot.lane.b32.xlu1 %v2370_v41, %s2082_s15  ;;  %s494_s15 = sand.u32 1, %s2065_s30  }
 0x40a   : > { %s1486_s17 = scalar_lea.sflag [#allocation5], %s494_s15 }
 0x411   : > { %v1898_v24 = vpop.eup %1897 }
 0x412   : > { %v778_v25 = vpack.c.bf16 %v1898_v24, %v1898_v24  ;;  %v775_v50 = vsel %vm722_vm4, %v1898_v24, 0.0 }
 0x414   : > { %1722 = vmatmul.mubr.msk.bf16.vlgmr.msra.gmra.mrb[12].mxu0 %vm722_vm4, %v778_v25 }
 0x415   : > { %1733 = vmatprep.mubr.msk.bf16.mxu0 %vm2079_vm1, %v2078_v8 }
 0x475   : > { %v885_v26 = vpop.xlane.xlu0 %884 }
 0x476   : > { %v886_v27 = vsub.f32 %v878_v3, %v885_v26 }
 0x478   : > { %v887_v28 = vmul.f32 1.442695, %v886_v27  ;;  %v1623_v27 = vld [vmem:[#allocation3] ss:$0 sm:$0xff] }
 0x479   : > { %v895_v30 = vpop.permute.xlu0 %894 }
 0x47a   : > { %1899 = vpow2.f32 %v887_v28  ;;  %v900_v31 = vsel %vm782_vm5, %v895_v30, 0 }
 0x47b   : > { %1732 = vmatpush3.bf16.msra.mxu0 %v900_v31 }
 0x47c   : > { %1743 = vmatprep.subr.bf16.mxu0 %v2078_v8 }
 0x47d   : > { %v1005_v32 = vpop.xlane.xlu1 %1004 }
 0x47e   : > { %v1006_v33 = vsub.f32 %v998_v10, %v1005_v32 }
 0x480   : > { %v1007_v34 = vmul.f32 1.442695, %v1006_v33 }
 0x482   : > { %1901 = vpow2.f32 %v1007_v34 }
 0x484   : > { %v1900_v35 = vpop.eup %1899 }
 0x485   : > { %v1124_v36 = vpop.xlane.xlu1 %1123  ;;  %v889_v37 = vsel %vm722_vm4, %v1900_v35, 0.0  ;;  %v892_v38 = vpack.c.bf16 %v1900_v35, %v1900_v35 }
 0x486   : > { %v1125_v39 = vsub.f32 %v1117_v16, %v1124_v36  ;;  %890 = vadd.xlane.f32.xlu0 %v889_v37 }
 0x487   : > { %1734 = vmatmul.mubr.msk.bf16.vlgmr.msra.gmra.mrb[16].mxu0 %vm722_vm4, %v892_v38 }
 0x488   : > { %v1126_v41 = vmul.f32 1.442695, %v1125_v39  ;;  %1744 = vmatpush3.bf16.msra.mxu0 %v1019_v40  ;;  %1745 = vmatprep.mubr.msk.bf16.mxu0 %vm2079_vm1, %v2078_v8  ;;  %v1883_v40 = vld [vmem:[%s2551_s10] sm:$0xff]  }
 0x489   : > { %1755 = vmatprep.subr.bf16.mxu0 %v2078_v8  ;;  %v1133_v43 = vpop.permute.xlu1 %1132 }
 0x48a   : > { %1903 = vpow2.f32 %v1126_v41  ;;  %v1138_v46 = vsel %vm782_vm5, %v1133_v43, 0  ;;  %v1885_v41 = vld [vmem:[%s2553_s12] sm:$0xff]  }
 0x48c   : > { %v1902_v42 = vpop.eup %1901 }
 0x48d   : > { %v1009_v44 = vsel %vm722_vm4, %v1902_v42, 0.0  ;;  %v1012_v45 = vpack.c.bf16 %v1902_v42, %v1902_v42 }
 0x48e   : > { %1010 = vadd.xlane.f32.xlu1 %v1009_v44 }
 0x48f   : > { %1746 = vmatmul.mubr.msk.bf16.vlgmr.msra.gmra.mrb[20].mxu0 %vm722_vm4, %v1012_v45 }
 0x490   : > { %1756 = vmatpush3.bf16.msra.mxu0 %v1138_v46  ;;  %1757 = vmatprep.mubr.msk.bf16.mxu0 %vm2079_vm1, %v2078_v8 }
 0x491   : > { %1769 = vmatprep.subr.bf16.mxu0 %v2078_v8 }
 0x494   : > { %v1904_v47 = vpop.eup %1903 }
 0x495   : > { %v1128_v48 = vsel %vm722_vm4, %v1904_v47, 0.0  ;;  %v1131_v49 = vpack.c.bf16 %v1904_v47, %v1904_v47 }
 0x496   : > { %1129 = vadd.xlane.f32.xlu0 %v1128_v48 }
 0x497   : > { %1758 = vmatmul.mubr.msk.bf16.vlgmr.msra.gmra.mrb[24].mxu0 %vm722_vm4, %v1131_v49 }
 0x498   : > { %1773 = vmatprep.mubr.msk.bf16.mxu0 %vm2079_vm1, %v2078_v8  ;;  %1770 = vmatpush3.bf16.msra.mxu0 %v1883_v40 }
 0x499   : > { %1771 = vmatprep.subr.bf16.mxu0 %v2078_v8 }
 0x49a   : > { %776 = vadd.xlane.f32.xlu0 %v775_v50 }
 0x4e7   : > { %v820_v51 = vpop.f32.mrb[12].mxu0 }
 0x4e8   : > { %v1723_v52 = vpop.f32.mrb[13].mxu0 }
 0x4e9   : > { %v823_v53 = vpop.f32.mrb[14].mxu0 }
 0x4ea   : > { %v1724_v54 = vpop.f32.mrb[15].mxu0  ;;  %v1628_v53 = vld [vmem:[#allocation8] ss:$0 sm:$0xff] }
 0x513   : > { %v891_v55 = vpop.xlane.xlu0 %890 }
 0x51b   : > { %v1011_v61 = vpop.xlane.xlu1 %1010 }
 0x523   : > { %v1130_v56 = vpop.xlane.xlu0 %1129 }
 0x527   : > { %v777_v57 = vpop.xlane.xlu0 %776 }
 0x528   : > { %1905 = vrcp.f32 %v777_v57  ;;  %v1886_v57 = vld [vmem:[%s2553_s12 + $0x8] sm:$0xff]  }
 0x529   : > { %1907 = vrcp.f32 %v891_v55 }
 0x52a   : > { %1909 = vrcp.f32 %v1011_v61  ;;  %v1890_v61 = vld [vmem:[%s2553_s12 + $0x28] sm:$0xff]  }
 0x52b   : > { %1911 = vrcp.f32 %v1130_v56 }
 0x532   : > { %v1906_v58 = vpop.eup %1905 }
 0x533   : > { %v827_v59 = vmul.f32 %v1906_v58, %v820_v51  ;;  %v1908_v62 = vpop.eup %1907  ;;  %v1627_v51 = vld [vmem:[#allocation6] ss:$0 sm:$0xff]  ;;  %v1887_v58 = vld [vmem:[%s2553_s12 + $0x10] sm:$0xff]  }
 0x534   : > { %v1910_v6 = vpop.eup %1909 }
 0x535   : > { %v828_v60 = vpack.c.bf16 %v827_v59, %v827_v59  ;;  %v1912_v16 = vpop.eup %1911  ;;  %v1888_v59 = vld [vmem:[%s2553_s12 + $0x18] sm:$0xff]  }
 0x537   : > { %830 = vst.msk [vmem:[#allocation2] sm:$0xf] %vm829_vm7, %v828_v60  ;;  %v1889_v60 = vld [vmem:[%s2553_s12 + $0x20] sm:$0xff]  }
 0x55a   : > { %v936_v63 = vpop.f32.mrb[16].mxu0 }
 0x55b   : > { %v943_v1 = vmul.f32 %v1908_v62, %v936_v63  ;;  %v1735_v2 = vpop.f32.mrb[17].mxu0  ;;  %v1891_v62 = vld [vmem:[%s2553_s12 + $0x30] sm:$0xff]   ;;  %v1892_v63 = vld [vmem:[%s2553_s12 + $0x38] sm:$0xff]  }
 0x55c   : > { %v939_v3 = vpop.f32.mrb[18].mxu0 }
 0x55d   : > { %v1646_v4 = vpack.c.bf16 %v943_v1, %v943_v1  ;;  %v1736_v5 = vpop.f32.mrb[19].mxu0  ;;  %v1629_v1 = vld [vmem:[%s2552_s11] ss:$0 sm:$0xff] }
 0x55f   : > { %948 = vrot.lane.b32.xlu1 %v1646_v4, %s2083_s29  ;;  %s1599_s29 = sshll.u32 %s494_s15, 3 }
 0x562   : > { %v1055_v7 = vpop.f32.mrb[20].mxu0 }
 0x563   : > { %v1062_v10 = vmul.f32 %v1910_v6, %v1055_v7  ;;  %v1747_v11 = vpop.f32.mrb[21].mxu0 }
 0x564   : > { %v1058_v12 = vpop.f32.mrb[22].mxu0 }
 0x565   : > { %v1647_v14 = vpack.c.bf16 %v1062_v10, %v1062_v10  ;;  %v1748_v15 = vpop.f32.mrb[23].mxu0 }
 0x567   : > { %1067 = vrot.lane.b32.xlu0 %v1647_v14, %s2084_s19  ;;  %s496_s19 = scalar_lea.vmem [#allocation9], %s1599_s29  ;;  %s2009_s29 = scalar_lea.vmem %s2008_s21, 256 }
 0x56a   : > { %v1174_v17 = vpop.f32.mrb[24].mxu0 }
 0x56b   : > { %v1181_v18 = vmul.f32 %v1912_v16, %v1174_v17  ;;  %v1759_v19 = vpop.f32.mrb[25].mxu0  ;;  %v1633_v17 = vld [vmem:[%s2554_s13] ss:$0 sm:$0xff] }
 0x56c   : > { %v1177_v20 = vpop.f32.mrb[26].mxu0 }
 0x56d   : > { %v1648_v21 = vpack.c.bf16 %v1181_v18, %v1181_v18  ;;  %v1760_v22 = vpop.f32.mrb[27].mxu0 }
 0x56f   : > { %1186 = vrot.lane.b32.xlu1 %v1648_v21, %s2085_s20  ;;  %s1499_s20 = sshll.u32 %s496_s19, 4  ;;  %s2500_s20 = int_to_ptr.vmem [resolvable:$true] %s1499_s20 }
 0x570   : > { %s2003_s16 = scalar_lea.vmem %s2500_s20, 128  ;;  %p2010_p4 = scmp.lt.s32.totalorder %s2500_s20, %s2008_s21 }
 0x571   : > { %p2004_p12 = scmp.ne.s32.totalorder %s2500_s20, %s2003_s16  ;;  %p2011_p7 = scmp.lt.s32.totalorder %s2009_s29, %s2003_s16 }
 0x573   : > { %p2005_p2 = pnand %p2004_p12, %p2588_p10  ;;  %p2012_p8 = por %p2011_p7, %p2010_p4 }
 0x575   : > { %p2006_p3 = pneg %p2005_p2 }
 0x577   : > { %p2013_p11 = pnand %p2012_p8, %p2006_p3 }
 0x5d1   : > { %v949_v23 = vpop.permute.xlu1 %948 }
 0x5d2   : > { %952 = vst.msk [vmem:[#allocation2] sm:$0xf] %vm951_vm8, %v949_v23 }
 0x5d9   : > { %v1068_v24 = vpop.permute.xlu0 %1067 }
 0x5da   : > { %1071 = vst.msk [vmem:[#allocation2] sm:$0xf] %vm1070_vm9, %v1068_v24 }
 0x5e1   : > { %v1187_v25 = vpop.permute.xlu1 %1186 }
 0x5e2   : > { %1190 = vst.msk [vmem:[#allocation2] sm:$0xf] %vm1189_vm10, %v1187_v25 }
 0x5e9   : > { %v1191_v26 = vld [vmem:[#allocation2] sm:$0xf] }
 0x5ea   : > { %1766 = vmatmul.mubr.msk.bf16.vlgmr.msra.gmra.mrb[16].mxu1 %vm505_vm0, %v1191_v26 }
 0x5eb   : > { %1793 = vmatprep.mubr.msk.bf16.mxu1 %vm2079_vm1, %v2078_v8  ;;  %1778 = vmatpush3.bf16.msra.mxu1 %v1885_v41 }
 0x5ec   : > { %1779 = vmatprep.subr.bf16.mxu1 %v2078_v8 }
 0x5ef   : > { %1780 = vmatpush3.bf16.msra.mxu1 %v1886_v57 }
 0x5f0   : > { %1781 = vmatprep.subr.bf16.mxu1 %v2078_v8 }
 0x5f3   : > { %1782 = vmatpush3.bf16.msra.mxu1 %v1887_v58 }
 0x5f4   : > { %1783 = vmatprep.subr.bf16.mxu1 %v2078_v8 }
 0x5f7   : > { %1784 = vmatpush3.bf16.msra.mxu1 %v1888_v59 }
 0x5f8   : > { %1785 = vmatprep.subr.bf16.mxu1 %v2078_v8 }
 0x5fb   : > { %1786 = vmatpush3.bf16.msra.mxu1 %v1889_v60 }
 0x5fc   : > { %1787 = vmatprep.subr.bf16.mxu1 %v2078_v8 }
 0x5ff   : > { %1788 = vmatpush3.bf16.msra.mxu1 %v1890_v61 }
 0x600   : > { %1789 = vmatprep.subr.bf16.mxu1 %v2078_v8 }
 0x603   : > { %1790 = vmatpush3.bf16.msra.mxu1 %v1891_v62 }
 0x604   : > { %1791 = vmatprep.subr.bf16.mxu1 %v2078_v8 }
 0x607   : > { %1792 = vmatpush3.bf16.msra.mxu1 %v1892_v63 }
 0x6bd   : > { %v1252_v28 = vpop.f32.mrb[16].mxu1 }
 0x6be   : > { %v1253_v29 = vadd.f32 %v1623_v27, %v1252_v28  ;;  %v1767_v30 = vpop.f32.mrb[17].mxu1 }
 0x6bf   : > { %v1255_v31 = vpop.f32.mrb[18].mxu1 }
 0x6c0   : > { %v2441_v32 = vadd.f32 %v1253_v29, %v2314_v0  ;;  %v1768_v33 = vpop.f32.mrb[19].mxu1  ;;  %v1884_v0 = vld [vmem:[%s2551_s10 + $0x8] sm:$0xff]  }
 0x6c1   : > { %1772 = vmatpush3.bf16.msra.mxu0 %v1884_v0 }
 0x6c2   : > { %v1261_v34 = vsel %vm505_vm0, %v2441_v32, 0.0 }
 0x6c3   : > { %1262 = vadd.xlane.f32.xlu1 %v1261_v34 }
 0x750   : > { %v1263_v35 = vpop.xlane.xlu1 %1262 }
 0x751   : > { %v1264_v36 = vmul.f32 0.03125, %v1263_v35 }
 0x753   : > { %v1265_v37 = vsub.f32 %v2441_v32, %v1264_v36 }
 0x755   : > { %v1266_v38 = vmul.f32 %v1265_v37, %v1265_v37 }
 0x757   : > { %v1267_v39 = vsel %vm505_vm0, %v1266_v38, 0.0 }
 0x758   : > { %1268 = vadd.xlane.f32.xlu0 %v1267_v39 }
 0x7e5   : > { %v1269_v42 = vpop.xlane.xlu0 %1268 }
 0x7e6   : > { %v1270_v43 = vmul.f32 0.03125, %v1269_v42 }
 0x7e8   : > { %v1271_v44 = vadd.f32 1e-05, %v1270_v43 }
 0x7ea   : > { %1913 = vrsqrt.f32 %v1271_v44  ;;  %vm1274_vm11 = vcmp.eq.f32.partialorder %v1271_v44, inf  ;;  %v1277_v47 = vand.u32 2147483648, %v1271_v44  ;;  %vm1276_vm12 = vcmp.eq.f32.partialorder %v1271_v44, 0.0 }
 0x7f4   : > { %v1914_v45 = vpop.eup %1913 }
 0x7f5   : > { %v1273_v46 = vmul.f32 %v1914_v45, %v1271_v44 }
 0x7f7   : > { %v1275_v48 = vsel %vm1274_vm11, %v1271_v44, %v1273_v46 }
 0x7f8   : > { %v1278_v49 = vsel %vm1276_vm12, %v1277_v47, %v1275_v48 }
 0x7f9   : > { %1915 = vrcp.f32 %v1278_v49 }
 0x803   : > { %v1916_v50 = vpop.eup %1915 }
 0x804   : > { %v1280_v52 = vmul.f32 %v1916_v50, %v1265_v37 }
 0x806   : > { %v1287_v54 = vmul.f32 %v1627_v51, %v1280_v52 }
 0x808   : > { %v1294_v55 = vadd.f32 %v1628_v53, %v1287_v54 }
 0x80a   : > { %v1295_v56 = vpack.c.bf16 %v1294_v55, %v1294_v55 }
 0x80c   : > { %1774 = vmatmul.mubr.msk.bf16.vlgmr.msra.gmra.mrb[28].mxu0 %vm505_vm0, %v1295_v56 }
 0x8df   : > { %v1356_v2 = vpop.f32.mrb[28].mxu0 }
 0x8e0   : > { %v1357_v3 = vadd.f32 %v1629_v1, %v1356_v2  ;;  %v1775_v4 = vpop.f32.mrb[29].mxu0 }
 0x8e1   : > { %v1359_v5 = vpop.f32.mrb[30].mxu0 }
 0x8e2   : > { %v1363_v6 = vmul.f32 0.044715, %v1357_v3  ;;  %v1776_v7 = vpop.f32.mrb[31].mxu0  ;;  %v1362_v8 = vmul.f32 0.5, %v1357_v3 }
 0x8e4   : > { %v1364_v9 = vmul.f32 %v1363_v6, %v1357_v3 }
 0x8e6   : > { %v1365_v10 = vmul.f32 %v1364_v9, %v1357_v3 }
 0x8e8   : > { %v1366_v11 = vadd.f32 %v1365_v10, %v1357_v3 }
 0x8ea   : > { %v1367_v12 = vmul.f32 0.7978846, %v1366_v11 }
 0x8ec   : > { %1917 = vtanh.f32 %v1367_v12 }
 0x8f6   : > { %v1918_v13 = vpop.eup %1917 }
 0x8f7   : > { %v1369_v14 = vadd.f32 1.0, %v1918_v13 }
 0x8f9   : > { %v1370_v15 = vmul.f32 %v1369_v14, %v1362_v8 }
 0x8fb   : > { %v1371_v16 = vpack.c.bf16 %v1370_v15, %v1370_v15 }
 0x8fd   : > { %1794 = vmatmul.mubr.bf16.vlgmr.msra.gmra.mrb[20].mxu1 %v1371_v16 }
 0x9d0   : > { %v1477_v18 = vpop.f32.mrb[20].mxu1 }
 0x9d1   : > { %v1478_v19 = vadd.f32 %v1633_v17, %v1477_v18  ;;  %v1795_v20 = vpop.f32.mrb[21].mxu1 }
 0x9d2   : > { %v1480_v21 = vpop.f32.mrb[22].mxu1 }
 0x9d3   : > { %v1483_v22 = vadd.f32 %v1478_v19, %v2441_v32  ;;  %v1796_v23 = vpop.f32.mrb[23].mxu1 }
 0x9d5   : > { %1484 = vst.msk [vmem:[%s496_s19] sm:$0xff] %vm505_vm0, %v1483_v22 }
 0x9d6   : > { %2016 = shalt.err (!%p2013_p11)
}
 0x9d7   : > { %s2017_s15 = scalar_lea.hbm %s2498_s24, 128  ;;  %s2021_s23 = scalar_lea.hbm %s2587_s25, 256 }
 0x9d8   : > { %p2018_p13 = scmp.ne.s32.totalorder %s2498_s24, %s2017_s15  ;;  %p2022_p6 = scmp.lt.u32.totalorder %s2498_s24, %s2587_s25 }
 0x9d9   : > { %p2023_p5 = scmp.lt.u32.totalorder %s2021_s23, %s2017_s15  ;;  %p2025_p12 = scmp.lt.u32.totalorder %s2017_s15, %s2498_s24 }
 0x9da   : > { %p2019_p0 = pnand %p2018_p13, %p2588_p10 }
 0x9db   : > { %p2024_p9 = por %p2023_p5, %p2022_p6 }
 0x9dc   : > { %p2020_p1 = pneg %p2019_p0 }
 0x9dd   : > { %p2026_p2 = por %p2025_p12, %p2024_p9 }
 0x9df   : > { %p2027_p3 = pnand %p2026_p2, %p2020_p1 }
 0x9e1   : > { %2030 = shalt.err (!%p2027_p3)
}
 0x9e2   : > { %1809 = dma.vmem_to_hbm [thread:$0]  (%p2588_p10), %s2500_s20, 128, %s2498_s24, %s1486_s17  }
 0x9e3 PF: > { %s2589_s28 = sld [smem:[#allocation15_spill]]  ;;  %s2590_s16 = sld [smem:[#allocation13_spill]] }
 0x9e4   : > { %s2591_s26 = sld [smem:[#allocation19_spill]] }
 0x9e9   : > { %p1831_p4 = scmp.ge.s32.totalorder %s2589_s28, 2  ;;  %s1511_s21 = sand.u32 1, %s2590_s16  }
 0x9ea   : > { %p2592_p7 = scmp.ne.s32.totalorder %s2591_s26, 0  ;;  %s1512_s29 = scalar_lea.sflag [#allocation5], %s1511_s21 }
 0x9ec   : > { %p1822_p8 = pnand %p1831_p4, %p2592_p7 }
 0x9ee   : > { %2056 = dma.done.wait (!%p1822_p8), %s1512_s29, 128  }
 0x9ef   : > { %2058 = vsyncadd (!%p1822_p8), %s1512_s29, 4294967168  ;;  %s2593_s16 = sld [smem:[#allocation16_spill]]  ;;  %s2594_s15 = sld [smem:[#allocation14_spill]] }
 0x9f0   : > { %s2595_s27 = sld [smem:[#allocation17_spill]]  ;;  %s2596_s29 = smov %s2065_s30 }
 0x9f5   : > { %p26_p11 = scmp.ge.s32.totalorder %s2593_s16, 4   ;;  %s2597_s30 = smov %s2594_s15 }
 0x9f6   : > { %s2598_s15 = smov %s2595_s27 }
 0x9f7   :  { %28 = sbr.rel (!%p26_p11) target bundleno = 7 (0x7), region = 124 }
 0x9fe   :  { %1517 = vsyncpa [#allocation4], 1 }
 0x9ff   :  { %1519 = vsyncpa [#allocation4 + $0x1], 1 }
 0xa00   :  { %1520 = vsyncpa [#allocation7], 1 }
 0xa01   :  { %1521 = vsyncpa [#allocation5], 1 }
 0xa02   :  { %1523 = vsyncpa [#allocation5 + $0x1], 1 }

</bundles_post_ra>
